<compile_context>
chip_gen: v7x
topology: tpu7x:2x2x1
jax: 0.10.0
libtpu: 0.0.40
codegen_flags: <defaults>
</compile_context>

<pallas_src>
import numpy as np
import jax
import jax.numpy as jnp
from jax.experimental import pallas as pl
from jax.experimental.pallas import tpu as pltpu

NUM_CHANNELS = [16, 32, 64]
FORECAST_HORIZON = 3
KERNEL_SIZE = 2          # the kernel hard-codes the k=2 causal (pad-left, truncate) form


# ----------------------------- fused Pallas kernel -------------------------------- #

def _make_fused_kernel(B, win, pad, num_inputs, dilations, channels, bias_slices,
                       compute_dtype):
    """Dual-stream (fwd|bwd) TCN + final Linear, single grid point.

    Activation layout: (B*win, 2*C) with [fwd | bwd] on the lane axis; weights are
    block-diagonal in the two streams so every matmul is shared by both directions.
    """
    BL = B * win
    c_last = 2 * channels[-1]

    def kernel(*refs):
        x_ref = refs[0]
        w_refs = refs[1:1 + 2 * len(channels)]
        w_lin_ref, bias_ref, out_ref = refs[-3], refs[-2], refs[-1]

        def bias(i):
            off, width = bias_slices[i]
            return bias_ref[:, off:off + width]            # (1, width) f32

        def mm(a, w):                                       # MXU, f32 accumulation
            return jnp.dot(a, w, preferred_element_type=jnp.float32)

        # Row r = b*win + t.  NOTE: t must stay in sync with the wrapper's window
        # slicing / left-padding: pltpu.roll wraps across batch row-groups and across
        # the zero pad, and the (t >= d + pad) mask zeroes exactly those rows, which is
        # what per-layer causal zero-padding requires.
        t = jax.lax.broadcasted_iota(jnp.int32, (BL, 1), 0) % win

        def shift(v, d, mask):                              # causal shift on the XLU
            rolled = pltpu.roll(v, shift=d, axis=0)
            return jnp.where(mask, rolled, jnp.zeros_like(rolled))

        x = x_ref[...]                                      # (BL, 2*num_inputs) f32
        bi = 0
        for li, (d, cout) in enumerate(zip(dilations, channels)):
            mask = t >= (d + pad)                           # hoisted: one compare / level
            w1_ref, w2_ref = w_refs[2 * li], w_refs[2 * li + 1]
            r2 = 2 * cout

            # conv1 (both taps) + 1x1 residual conv: two matmuls, no lane concat.
            xc = x.astype(compute_dtype)
            sxc = shift(x, d, mask).astype(compute_dtype)
            o1 = mm(sxc, w1_ref[0]) + mm(xc, w1_ref[1]) + bias(bi)   # (BL, 4*cout) f32
            bi += 1
            h1 = jnp.maximum(o1[:, :r2], 0.0)               # [h1_f | h1_b], f32
            res = o1[:, r2:]                                # [res_f | res_b], f32

            # conv2 (both taps).
            h1c = h1.astype(compute_dtype)
            sh1c = shift(h1, d, mask).astype(compute_dtype)
            if r2 % 128 == 0:
                # both halves are 128-lane aligned: single concat + one K=2*r2 MXU pass
                o2 = mm(jnp.concatenate([sh1c, h1c], axis=-1), w2_ref[...]) + bias(bi)
            else:
                o2 = mm(sh1c, w2_ref[0]) + mm(h1c, w2_ref[1]) + bias(bi)
            bi += 1
            x = jnp.maximum(o2, 0.0) + res   # TemporalBlock output (no trailing ReLU)

        # Last time step of each batch row-group.  win is a multiple of 8 (wrapper
        # guarantees it), so the reshape is layout-preserving and this is one strided
        # sublane select instead of B slice+concat copies.
        feat = x.reshape(B, win, c_last)[:, win - 1, :].astype(compute_dtype)  # (B, 2*C)
        out_ref[...] = mm(feat, w_lin_ref[...]) + bias(bi)

    return kernel


# ----------------------------- parameter fusion (trace time) ---------------------- #

def _fuse_params(fwd_blocks, bwd_blocks, num_inputs, compute_dtype):
    """Fuse per-stream PyTorch conv params into two slabs per block.

    conv1 slab: rows [*_f | *_b] (2*cin), cols [h1_f | h1_b | res_f | res_b] (4*cout),
                stacked on a leading dim: [0]=shift tap, [1]=current tap (+ 1x1 residual).
    conv2 slab: cols [h2_f | h2_b] (2*cout); same tap stacking, except the level whose
                2*cout is a multiple of 128 keeps a 2D (4*cout, 2*cout) stack for the
                single lane-aligned concat matmul.
    fwd/bwd streams are block-diagonal so both directions share every matmul.
    """
    weights, bias_segs = [], []
    cin = num_inputs
    for bf, bb, cout in zip(fwd_blocks, bwd_blocks, NUM_CHANNELS):
        def tap(blk, name, k):
            return blk[name][:, :, k].T                     # (cin|cout, cout)
        zi = jnp.zeros((cin, cout), jnp.float32)
        zo = jnp.zeros((cout, cout), jnp.float32)

        w1_shift = jnp.concatenate([
            jnp.concatenate([tap(bf, "w1", 0), zi, zi, zi], axis=1),
            jnp.concatenate([zi, tap(bb, "w1", 0), zi, zi], axis=1)], axis=0)
        w1_cur = jnp.concatenate([
            jnp.concatenate([tap(bf, "w1", 1), zi, tap(bf, "wn", 0), zi], axis=1),
            jnp.concatenate([zi, tap(bb, "w1", 1), zi, tap(bb, "wn", 0)], axis=1)], axis=0)
        w1 = jnp.stack([w1_shift, w1_cur], axis=0)          # (2, 2*cin, 4*cout)
        b1 = jnp.concatenate([bf["b1"], bb["b1"], bf["bn"], bb["bn"]])[None, :]

        w2_shift = jnp.concatenate([
            jnp.concatenate([tap(bf, "w2", 0), zo], axis=1),
            jnp.concatenate([zo, tap(bb, "w2", 0)], axis=1)], axis=0)
        w2_cur = jnp.concatenate([
            jnp.concatenate([tap(bf, "w2", 1), zo], axis=1),
            jnp.concatenate([zo, tap(bb, "w2", 1)], axis=1)], axis=0)
        if (2 * cout) % 128 == 0:
            w2 = jnp.concatenate([w2_shift, w2_cur], axis=0)    # (4*cout, 2*cout)
        else:
            w2 = jnp.stack([w2_shift, w2_cur], axis=0)          # (2, 2*cout, 2*cout)
        b2 = jnp.concatenate([bf["b2"], bb["b2"]])[None, :]

        weights += [w1.astype(compute_dtype), w2.astype(compute_dtype)]
        bias_segs += [b1, b2]
        cin = cout
    return weights, bias_segs


def _pack_biases(segs):
    """Pack all bias rows into ONE (1, W) f32 operand (cuts operand DMAs 15 -> 9);
    each segment starts at a 128-lane multiple so in-kernel slices are start-aligned."""
    parts, slices, off = [], [], 0
    for s in segs:
        w = s.shape[1]
        slices.append((off, w))
        parts.append(s.astype(jnp.float32))
        lane_pad = (-w) % 128
        if lane_pad:
            parts.append(jnp.zeros((1, lane_pad), jnp.float32))
        off += w + lane_pad
    return jnp.concatenate(parts, axis=1), slices


# ----------------------------- wrapper --------------------------------------------- #

def bidirectional_tcn_pallas(x_ncl, fwd_blocks, bwd_blocks, w_lin, b_lin,
                             *, compute_dtype=jnp.float32):
    """x_ncl: (B, num_inputs, L) like PyTorch NCL; returns (B, horizon, num_inputs)."""
    B, num_inputs, L = x_ncl.shape
    n_levels = len(NUM_CHANNELS)
    dilations = [2 ** i for i in range(n_levels)]

    x_blc = jnp.transpose(x_ncl, (0, 2, 1)).astype(jnp.float32)   # (B, L, C)
    x_rev = x_blc[:, ::-1, :]                                     # torch.flip(x, [2])

    # Only the last step feeds the Linear; with k=2 and dilations 1,2,4 the receptive
    # field is 15 steps.  Take at most 16 (sublane-rounded) real steps; if the sequence
    # is shorter, left-pad zeros (equivalent to causal zero padding once the in-kernel
    # shift mask is offset by `pad`).  Exact, not an approximation.
    rf = 1 + (KERNEL_SIZE - 1) * 2 * sum(dilations)               # = 15
    win = ((min(L, rf) + 7) // 8) * 8                             # multiple of 8
    if L >= win:
        pad = 0
        x_blc = x_blc[:, L - win:, :]
        x_rev = x_rev[:, L - win:, :]
    else:
        pad = win - L
        z = jnp.zeros((B, pad, num_inputs), jnp.float32)
        x_blc = jnp.concatenate([z, x_blc], axis=1)
        x_rev = jnp.concatenate([z, x_rev], axis=1)

    # fwd and bwd streams share every matmul: [fwd | bwd] on the channel (lane) axis.
    x_cat = jnp.concatenate([x_blc, x_rev], axis=-1).reshape(B * win, 2 * num_inputs)

    weights, bias_segs = _fuse_params(fwd_blocks, bwd_blocks, num_inputs, compute_dtype)
    bias_segs.append(b_lin[None, :].astype(jnp.float32))
    bias_pack, bias_slices = _pack_biases(bias_segs)
    operands = [x_cat] + weights + [w_lin.T.astype(compute_dtype), bias_pack]

    kernel = _make_fused_kernel(B, win, pad, num_inputs, dilations, NUM_CHANNELS,
                                bias_slices, compute_dtype)

    # VMEM budget derived from the actual operand footprint (portable across v5e/v6e/v7x
    # default scoped limits); re-derive when a batch grid is added.
    n_out = w_lin.shape[0]
    total_bytes = sum(int(np.prod(o.shape)) * o.dtype.itemsize for o in operands)
    total_bytes += B * n_out * 4
    vmem_limit = int(min(128 * 1024 * 1024, max(8 * 1024 * 1024, 16 * total_bytes)))

    vmem = pl.BlockSpec(memory_space=pltpu.MemorySpace.VMEM)
    out = pl.pallas_call(
        kernel,
        out_shape=jax.ShapeDtypeStruct((B, n_out), jnp.float32),
        in_specs=[vmem] * len(operands),
        out_specs=vmem,
        compiler_params=pltpu.CompilerParams(vmem_limit_bytes=vmem_limit),
    )(*operands)
    return out.reshape(B, FORECAST_HORIZON, -1)


# ----------------------------- deterministic init ---------------------------------- #

def init_params(key, num_inputs):
    keys = iter(jax.random.split(key, 64))

    def make_tcn(cin0):
        blocks = []
        cin = cin0
        for cout in NUM_CHANNELS:
            blocks.append(dict(
                w1=0.1 * jax.random.normal(next(keys), (cout, cin, KERNEL_SIZE), jnp.float32),
                b1=0.1 * jax.random.normal(next(keys), (cout,), jnp.float32),
                w2=0.1 * jax.random.normal(next(keys), (cout, cout, KERNEL_SIZE), jnp.float32),
                b2=0.1 * jax.random.normal(next(keys), (cout,), jnp.float32),
                wn=0.1 * jax.random.normal(next(keys), (cout, cin, 1), jnp.float32),
                bn=0.1 * jax.random.normal(next(keys), (cout,), jnp.float32),
            ))
            cin = cout
        return blocks

    fwd = make_tcn(num_inputs)
    bwd = make_tcn(num_inputs)
    n_out = num_inputs * FORECAST_HORIZON
    w_lin = 0.1 * jax.random.normal(next(keys), (n_out, NUM_CHANNELS[-1] * 2), jnp.float32)
    b_lin = 0.1 * jax.random.normal(next(keys), (n_out,), jnp.float32)
    return fwd, bwd, w_lin, b_lin


# ----------------------------- pure-JAX reference (PyTorch semantics) -------------- #

def _conv1d_ref(x_ncl, w, b, dilation, padding):
    B, Cin, L = x_ncl.shape
    Cout, _, K = w.shape
    xp = jnp.pad(x_ncl, ((0, 0), (0, 0), (padding, padding)))
    Lout = L + 2 * padding - dilation * (K - 1)
    out = jnp.zeros((B, Cout, Lout), jnp.float32) + b[None, :, None]
    for k in range(K):
        seg = xp[:, :, k * dilation: k * dilation + Lout]
        out = out + jnp.einsum("oc,bcl->bol", w[:, :, k], seg)
    return out


def _block_ref(x, blk, dilation):
    pad = (KERNEL_SIZE - 1) * dilation
    L = x.shape[2]
    out = jax.nn.relu(_conv1d_ref(x, blk["w1"], blk["b1"], dilation, pad))
    out = jax.nn.relu(_conv1d_ref(out, blk["w2"], blk["b2"], dilation, pad))
    res = _conv1d_ref(x, blk["wn"], blk["bn"], 1, 0)
    return out[:, :, :L] + res


def _tcn_ref(x, blocks):
    for i, blk in enumerate(blocks):
        x = _block_ref(x, blk, 2 ** i)
    return x


def bidirectional_ref(x, fwd, bwd, w_lin, b_lin):
    f = _tcn_ref(x, fwd)
    b = _tcn_ref(x[:, :, ::-1], bwd)
    feat = jnp.concatenate([f[:, :, -1], b[:, :, -1]], axis=1)
    out = feat @ w_lin.T + b_lin
    return out.reshape(x.shape[0], FORECAST_HORIZON, -1)


# ----------------------------- main ------------------------------------------------ #

if __name__ == "__main__":
    B, num_inputs, L = 2, 4, 16
    key = jax.random.PRNGKey(0)
    kx, kx2, kp = jax.random.split(key, 3)

    x = jax.random.normal(kx, (B, num_inputs, L), jnp.float32)     # PyTorch NCL input
    fwd, bwd, w_lin, b_lin = init_params(kp, num_inputs)

    ref = bidirectional_ref(x, fwd, bwd, w_lin, b_lin)

    # float32 operands: matches the PyTorch-semantics reference to tight tolerance.
    out = jax.block_until_ready(bidirectional_tcn_pallas(x, fwd, bwd, w_lin, b_lin))
    np.testing.assert_allclose(np.asarray(out), np.asarray(ref), rtol=1e-4, atol=1e-4)

    # Longer sequence exercises the exact receptive-field slicing path.
    x_long = jax.random.normal(kx2, (B, num_inputs, 64), jnp.float32)
    ref_long = bidirectional_ref(x_long, fwd, bwd, w_lin, b_lin)
    out_long = jax.block_until_ready(
        bidirectional_tcn_pallas(x_long, fwd, bwd, w_lin, b_lin))
    np.testing.assert_allclose(np.asarray(out_long), np.asarray(ref_long),
                               rtol=1e-4, atol=1e-4)

    # bfloat16 operands / f32 accumulation (the v6e/v7x-recommended setting): loose check.
    out_bf16 = jax.block_until_ready(
        bidirectional_tcn_pallas(x, fwd, bwd, w_lin, b_lin, compute_dtype=jnp.bfloat16))
    np.testing.assert_allclose(np.asarray(out_bf16), np.asarray(ref), rtol=1e-1, atol=1e-1)

    print("KERNEL_OK")
</pallas_src>

<mosaic_0001>
module attributes {stable_mosaic.version = 11 : i64} {
  func.func @kernel(%arg0: memref<32x8xf32, #tpu.memory_space<vmem>>, %arg1: memref<2x8x64xf32, #tpu.memory_space<vmem>>, %arg2: memref<2x32x32xf32, #tpu.memory_space<vmem>>, %arg3: memref<2x32x128xf32, #tpu.memory_space<vmem>>, %arg4: memref<2x64x64xf32, #tpu.memory_space<vmem>>, %arg5: memref<2x64x256xf32, #tpu.memory_space<vmem>>, %arg6: memref<256x128xf32, #tpu.memory_space<vmem>>, %arg7: memref<128x12xf32, #tpu.memory_space<vmem>>, %arg8: memref<1x1024xf32, #tpu.memory_space<vmem>>, %arg9: memref<2x12xf32, #tpu.memory_space<vmem>>) attributes {dimension_semantics = [], scalar_prefetch = 0 : i64, scratch_operands = 0 : i64, tpu.core_type = #tpu.core_type<tc>} {
    %0 = tpu.iota {dimensions = array<i32: 0>} : vector<32x1xi32>
    %c16_i32 = arith.constant 16 : i32
    %c0_i32 = arith.constant 0 : i32
    %1 = arith.cmpi eq, %c16_i32, %c0_i32 : i32
    %c1_i32 = arith.constant 1 : i32
    %2 = arith.select %1, %c1_i32, %c16_i32 : i32
    %3 = vector.broadcast %2 : i32 to vector<32x1xi32>
    %4 = arith.remsi %0, %3 : vector<32x1xi32>
    %c0_i32_0 = arith.constant 0 : i32
    %5 = vector.broadcast %c0_i32_0 : i32 to vector<32x1xi32>
    %6 = arith.cmpi ne, %4, %5 : vector<32x1xi32>
    %c0_i32_1 = arith.constant 0 : i32
    %7 = vector.broadcast %c0_i32_1 : i32 to vector<32x1xi32>
    %8 = arith.cmpi slt, %4, %7 : vector<32x1xi32>
    %c0_i32_2 = arith.constant 0 : i32
    %9 = arith.cmpi slt, %2, %c0_i32_2 : i32
    %10 = vector.broadcast %9 : i1 to vector<32x1xi1>
    %11 = vector.broadcast %10 : vector<32x1xi1> to vector<32x1xi1>
    %12 = arith.xori %8, %11 : vector<32x1xi1>
    %13 = arith.andi %12, %6 : vector<32x1xi1>
    %14 = vector.broadcast %2 : i32 to vector<32x1xi32>
    %15 = arith.addi %4, %14 : vector<32x1xi32>
    %16 = arith.select %13, %15, %4 : vector<32x1xi1>, vector<32x1xi32>
    %c0 = arith.constant 0 : index
    %c0_3 = arith.constant 0 : index
    %17 = vector.load %arg0[%c0, %c0_3] : memref<32x8xf32, #tpu.memory_space<vmem>>, vector<32x8xf32>
    %c1_i32_4 = arith.constant 1 : i32
    %18 = vector.broadcast %c1_i32_4 : i32 to vector<32x1xi32>
    %19 = arith.cmpi sge, %16, %18 : vector<32x1xi32>
    %c1_i32_5 = arith.constant 1 : i32
    %20 = tpu.dynamic_rotate %17 by %c1_i32_5 dim 0 : vector<32x8xf32>, i32 -> vector<32x8xf32>
    %cst = arith.constant 0.000000e+00 : f32
    %21 = vector.broadcast %cst : f32 to vector<32x8xf32>
    %22 = vector.shape_cast %19 : vector<32x1xi1> to vector<32x1xi1>
    %23 = vector.broadcast %22 : vector<32x1xi1> to vector<32x8xi1>
    %24 = arith.select %23, %20, %21 : vector<32x8xi1>, vector<32x8xf32>
    %c0_6 = arith.constant 0 : index
    %c0_7 = arith.constant 0 : index
    %c0_8 = arith.constant 0 : index
    %25 = vector.load %arg1[%c0_6, %c0_7, %c0_8] : memref<2x8x64xf32, #tpu.memory_space<vmem>>, vector<1x8x64xf32>
    %26 = vector.shape_cast %25 : vector<1x8x64xf32> to vector<8x64xf32>
    %cst_9 = arith.constant dense<0.000000e+00> : vector<32x64xf32>
    %27 = tpu.matmul %24, %26, %cst_9 {dimension_numbers = #tpu.dot_dimension_numbers<[1], [0], [0], [1], [0, 0, 1, 1], [], []>} : vector<32x8xf32>, vector<8x64xf32>, vector<32x64xf32> -> vector<32x64xf32>
    %c1 = arith.constant 1 : index
    %c0_10 = arith.constant 0 : index
    %c0_11 = arith.constant 0 : index
    %28 = vector.load %arg1[%c1, %c0_10, %c0_11] : memref<2x8x64xf32, #tpu.memory_space<vmem>>, vector<1x8x64xf32>
    %29 = vector.shape_cast %28 : vector<1x8x64xf32> to vector<8x64xf32>
    %cst_12 = arith.constant dense<0.000000e+00> : vector<32x64xf32>
    %30 = tpu.matmul %17, %29, %cst_12 {dimension_numbers = #tpu.dot_dimension_numbers<[1], [0], [0], [1], [0, 0, 1, 1], [], []>} : vector<32x8xf32>, vector<8x64xf32>, vector<32x64xf32> -> vector<32x64xf32>
    %31 = arith.addf %27, %30 : vector<32x64xf32>
    %c0_13 = arith.constant 0 : index
    %c0_14 = arith.constant 0 : index
    %32 = vector.load %arg8[%c0_13, %c0_14] : memref<1x1024xf32, #tpu.memory_space<vmem>>, vector<1x64xf32>
    %33 = vector.broadcast %32 : vector<1x64xf32> to vector<32x64xf32>
    %34 = arith.addf %31, %33 : vector<32x64xf32>
    %35 = vector.extract_strided_slice %34 {offsets = [0, 0], sizes = [32, 32], strides = [1, 1]} : vector<32x64xf32> to vector<32x32xf32>
    %cst_15 = arith.constant 0.000000e+00 : f32
    %36 = vector.broadcast %cst_15 : f32 to vector<32x32xf32>
    %37 = arith.maximumf %35, %36 : vector<32x32xf32>
    %38 = vector.extract_strided_slice %34 {offsets = [0, 32], sizes = [32, 32], strides = [1, 1]} : vector<32x64xf32> to vector<32x32xf32>
    %c1_i32_16 = arith.constant 1 : i32
    %39 = tpu.dynamic_rotate %37 by %c1_i32_16 dim 0 : vector<32x32xf32>, i32 -> vector<32x32xf32>
    %cst_17 = arith.constant 0.000000e+00 : f32
    %40 = vector.broadcast %cst_17 : f32 to vector<32x32xf32>
    %41 = vector.shape_cast %19 : vector<32x1xi1> to vector<32x1xi1>
    %42 = vector.broadcast %41 : vector<32x1xi1> to vector<32x32xi1>
    %43 = arith.select %42, %39, %40 : vector<32x32xi1>, vector<32x32xf32>
    %c0_18 = arith.constant 0 : index
    %c0_19 = arith.constant 0 : index
    %c0_20 = arith.constant 0 : index
    %44 = vector.load %arg2[%c0_18, %c0_19, %c0_20] : memref<2x32x32xf32, #tpu.memory_space<vmem>>, vector<1x32x32xf32>
    %45 = vector.shape_cast %44 : vector<1x32x32xf32> to vector<32x32xf32>
    %cst_21 = arith.constant dense<0.000000e+00> : vector<32x32xf32>
    %46 = tpu.matmul %43, %45, %cst_21 {dimension_numbers = #tpu.dot_dimension_numbers<[1], [0], [0], [1], [0, 0, 1, 1], [], []>} : vector<32x32xf32>, vector<32x32xf32>, vector<32x32xf32> -> vector<32x32xf32>
    %c1_22 = arith.constant 1 : index
    %c0_23 = arith.constant 0 : index
    %c0_24 = arith.constant 0 : index
    %47 = vector.load %arg2[%c1_22, %c0_23, %c0_24] : memref<2x32x32xf32, #tpu.memory_space<vmem>>, vector<1x32x32xf32>
    %48 = vector.shape_cast %47 : vector<1x32x32xf32> to vector<32x32xf32>
    %cst_25 = arith.constant dense<0.000000e+00> : vector<32x32xf32>
    %49 = tpu.matmul %37, %48, %cst_25 {dimension_numbers = #tpu.dot_dimension_numbers<[1], [0], [0], [1], [0, 0, 1, 1], [], []>} : vector<32x32xf32>, vector<32x32xf32>, vector<32x32xf32> -> vector<32x32xf32>
    %50 = arith.addf %46, %49 : vector<32x32xf32>
    %c0_26 = arith.constant 0 : index
    %c128 = arith.constant 128 : index
    %51 = vector.load %arg8[%c0_26, %c128] : memref<1x1024xf32, #tpu.memory_space<vmem>>, vector<1x32xf32>
    %52 = vector.broadcast %51 : vector<1x32xf32> to vector<32x32xf32>
    %53 = arith.addf %50, %52 : vector<32x32xf32>
    %cst_27 = arith.constant 0.000000e+00 : f32
    %54 = vector.broadcast %cst_27 : f32 to vector<32x32xf32>
    %55 = arith.maximumf %53, %54 : vector<32x32xf32>
    %56 = arith.addf %55, %38 : vector<32x32xf32>
    %c2_i32 = arith.constant 2 : i32
    %57 = vector.broadcast %c2_i32 : i32 to vector<32x1xi32>
    %58 = arith.cmpi sge, %16, %57 : vector<32x1xi32>
    %c2_i32_28 = arith.constant 2 : i32
    %59 = tpu.dynamic_rotate %56 by %c2_i32_28 dim 0 : vector<32x32xf32>, i32 -> vector<32x32xf32>
    %cst_29 = arith.constant 0.000000e+00 : f32
    %60 = vector.broadcast %cst_29 : f32 to vector<32x32xf32>
    %61 = vector.shape_cast %58 : vector<32x1xi1> to vector<32x1xi1>
    %62 = vector.broadcast %61 : vector<32x1xi1> to vector<32x32xi1>
    %63 = arith.select %62, %59, %60 : vector<32x32xi1>, vector<32x32xf32>
    %c0_30 = arith.constant 0 : index
    %c0_31 = arith.constant 0 : index
    %c0_32 = arith.constant 0 : index
    %64 = vector.load %arg3[%c0_30, %c0_31, %c0_32] : memref<2x32x128xf32, #tpu.memory_space<vmem>>, vector<1x32x128xf32>
    %65 = vector.shape_cast %64 : vector<1x32x128xf32> to vector<32x128xf32>
    %cst_33 = arith.constant dense<0.000000e+00> : vector<32x128xf32>
    %66 = tpu.matmul %63, %65, %cst_33 {dimension_numbers = #tpu.dot_dimension_numbers<[1], [0], [0], [1], [0, 0, 1, 1], [], []>} : vector<32x32xf32>, vector<32x128xf32>, vector<32x128xf32> -> vector<32x128xf32>
    %c1_34 = arith.constant 1 : index
    %c0_35 = arith.constant 0 : index
    %c0_36 = arith.constant 0 : index
    %67 = vector.load %arg3[%c1_34, %c0_35, %c0_36] : memref<2x32x128xf32, #tpu.memory_space<vmem>>, vector<1x32x128xf32>
    %68 = vector.shape_cast %67 : vector<1x32x128xf32> to vector<32x128xf32>
    %cst_37 = arith.constant dense<0.000000e+00> : vector<32x128xf32>
    %69 = tpu.matmul %56, %68, %cst_37 {dimension_numbers = #tpu.dot_dimension_numbers<[1], [0], [0], [1], [0, 0, 1, 1], [], []>} : vector<32x32xf32>, vector<32x128xf32>, vector<32x128xf32> -> vector<32x128xf32>
    %70 = arith.addf %66, %69 : vector<32x128xf32>
    %c0_38 = arith.constant 0 : index
    %c256 = arith.constant 256 : index
    %71 = vector.load %arg8[%c0_38, %c256] : memref<1x1024xf32, #tpu.memory_space<vmem>>, vector<1x128xf32>
    %72 = vector.broadcast %71 : vector<1x128xf32> to vector<32x128xf32>
    %73 = arith.addf %70, %72 : vector<32x128xf32>
    %74 = vector.extract_strided_slice %73 {offsets = [0, 0], sizes = [32, 64], strides = [1, 1]} : vector<32x128xf32> to vector<32x64xf32>
    %cst_39 = arith.constant 0.000000e+00 : f32
    %75 = vector.broadcast %cst_39 : f32 to vector<32x64xf32>
    %76 = arith.maximumf %74, %75 : vector<32x64xf32>
    %77 = vector.extract_strided_slice %73 {offsets = [0, 64], sizes = [32, 64], strides = [1, 1]} : vector<32x128xf32> to vector<32x64xf32>
    %c2_i32_40 = arith.constant 2 : i32
    %78 = tpu.dynamic_rotate %76 by %c2_i32_40 dim 0 : vector<32x64xf32>, i32 -> vector<32x64xf32>
    %cst_41 = arith.constant 0.000000e+00 : f32
    %79 = vector.broadcast %cst_41 : f32 to vector<32x64xf32>
    %80 = vector.shape_cast %58 : vector<32x1xi1> to vector<32x1xi1>
    %81 = vector.broadcast %80 : vector<32x1xi1> to vector<32x64xi1>
    %82 = arith.select %81, %78, %79 : vector<32x64xi1>, vector<32x64xf32>
    %c0_42 = arith.constant 0 : index
    %c0_43 = arith.constant 0 : index
    %c0_44 = arith.constant 0 : index
    %83 = vector.load %arg4[%c0_42, %c0_43, %c0_44] : memref<2x64x64xf32, #tpu.memory_space<vmem>>, vector<1x64x64xf32>
    %84 = vector.shape_cast %83 : vector<1x64x64xf32> to vector<64x64xf32>
    %cst_45 = arith.constant dense<0.000000e+00> : vector<32x64xf32>
    %85 = tpu.matmul %82, %84, %cst_45 {dimension_numbers = #tpu.dot_dimension_numbers<[1], [0], [0], [1], [0, 0, 1, 1], [], []>} : vector<32x64xf32>, vector<64x64xf32>, vector<32x64xf32> -> vector<32x64xf32>
    %c1_46 = arith.constant 1 : index
    %c0_47 = arith.constant 0 : index
    %c0_48 = arith.constant 0 : index
    %86 = vector.load %arg4[%c1_46, %c0_47, %c0_48] : memref<2x64x64xf32, #tpu.memory_space<vmem>>, vector<1x64x64xf32>
    %87 = vector.shape_cast %86 : vector<1x64x64xf32> to vector<64x64xf32>
    %cst_49 = arith.constant dense<0.000000e+00> : vector<32x64xf32>
    %88 = tpu.matmul %76, %87, %cst_49 {dimension_numbers = #tpu.dot_dimension_numbers<[1], [0], [0], [1], [0, 0, 1, 1], [], []>} : vector<32x64xf32>, vector<64x64xf32>, vector<32x64xf32> -> vector<32x64xf32>
    %89 = arith.addf %85, %88 : vector<32x64xf32>
    %c0_50 = arith.constant 0 : index
    %c384 = arith.constant 384 : index
    %90 = vector.load %arg8[%c0_50, %c384] : memref<1x1024xf32, #tpu.memory_space<vmem>>, vector<1x64xf32>
    %91 = vector.broadcast %90 : vector<1x64xf32> to vector<32x64xf32>
    %92 = arith.addf %89, %91 : vector<32x64xf32>
    %cst_51 = arith.constant 0.000000e+00 : f32
    %93 = vector.broadcast %cst_51 : f32 to vector<32x64xf32>
    %94 = arith.maximumf %92, %93 : vector<32x64xf32>
    %95 = arith.addf %94, %77 : vector<32x64xf32>
    %c4_i32 = arith.constant 4 : i32
    %96 = vector.broadcast %c4_i32 : i32 to vector<32x1xi32>
    %97 = arith.cmpi sge, %16, %96 : vector<32x1xi32>
    %c4_i32_52 = arith.constant 4 : i32
    %98 = tpu.dynamic_rotate %95 by %c4_i32_52 dim 0 : vector<32x64xf32>, i32 -> vector<32x64xf32>
    %cst_53 = arith.constant 0.000000e+00 : f32
    %99 = vector.broadcast %cst_53 : f32 to vector<32x64xf32>
    %100 = vector.shape_cast %97 : vector<32x1xi1> to vector<32x1xi1>
    %101 = vector.broadcast %100 : vector<32x1xi1> to vector<32x64xi1>
    %102 = arith.select %101, %98, %99 : vector<32x64xi1>, vector<32x64xf32>
    %c0_54 = arith.constant 0 : index
    %c0_55 = arith.constant 0 : index
    %c0_56 = arith.constant 0 : index
    %103 = vector.load %arg5[%c0_54, %c0_55, %c0_56] : memref<2x64x256xf32, #tpu.memory_space<vmem>>, vector<1x64x256xf32>
    %104 = vector.shape_cast %103 : vector<1x64x256xf32> to vector<64x256xf32>
    %cst_57 = arith.constant dense<0.000000e+00> : vector<32x256xf32>
    %105 = tpu.matmul %102, %104, %cst_57 {dimension_numbers = #tpu.dot_dimension_numbers<[1], [0], [0], [1], [0, 0, 1, 1], [], []>} : vector<32x64xf32>, vector<64x256xf32>, vector<32x256xf32> -> vector<32x256xf32>
    %c1_58 = arith.constant 1 : index
    %c0_59 = arith.constant 0 : index
    %c0_60 = arith.constant 0 : index
    %106 = vector.load %arg5[%c1_58, %c0_59, %c0_60] : memref<2x64x256xf32, #tpu.memory_space<vmem>>, vector<1x64x256xf32>
    %107 = vector.shape_cast %106 : vector<1x64x256xf32> to vector<64x256xf32>
    %cst_61 = arith.constant dense<0.000000e+00> : vector<32x256xf32>
    %108 = tpu.matmul %95, %107, %cst_61 {dimension_numbers = #tpu.dot_dimension_numbers<[1], [0], [0], [1], [0, 0, 1, 1], [], []>} : vector<32x64xf32>, vector<64x256xf32>, vector<32x256xf32> -> vector<32x256xf32>
    %109 = arith.addf %105, %108 : vector<32x256xf32>
    %c0_62 = arith.constant 0 : index
    %c512 = arith.constant 512 : index
    %110 = vector.load %arg8[%c0_62, %c512] : memref<1x1024xf32, #tpu.memory_space<vmem>>, vector<1x256xf32>
    %111 = vector.broadcast %110 : vector<1x256xf32> to vector<32x256xf32>
    %112 = arith.addf %109, %111 : vector<32x256xf32>
    %113 = vector.extract_strided_slice %112 {offsets = [0, 0], sizes = [32, 128], strides = [1, 1]} : vector<32x256xf32> to vector<32x128xf32>
    %cst_63 = arith.constant 0.000000e+00 : f32
    %114 = vector.broadcast %cst_63 : f32 to vector<32x128xf32>
    %115 = arith.maximumf %113, %114 : vector<32x128xf32>
    %116 = vector.extract_strided_slice %112 {offsets = [0, 128], sizes = [32, 128], strides = [1, 1]} : vector<32x256xf32> to vector<32x128xf32>
    %c4_i32_64 = arith.constant 4 : i32
    %117 = tpu.dynamic_rotate %115 by %c4_i32_64 dim 0 : vector<32x128xf32>, i32 -> vector<32x128xf32>
    %cst_65 = arith.constant 0.000000e+00 : f32
    %118 = vector.broadcast %cst_65 : f32 to vector<32x128xf32>
    %119 = vector.shape_cast %97 : vector<32x1xi1> to vector<32x1xi1>
    %120 = vector.broadcast %119 : vector<32x1xi1> to vector<32x128xi1>
    %121 = arith.select %120, %117, %118 : vector<32x128xi1>, vector<32x128xf32>
    %122 = tpu.concatenate %121, %115 in 1 : vector<32x128xf32>, vector<32x128xf32> -> vector<32x256xf32>
    %c0_66 = arith.constant 0 : index
    %c0_67 = arith.constant 0 : index
    %123 = vector.load %arg6[%c0_66, %c0_67] : memref<256x128xf32, #tpu.memory_space<vmem>>, vector<256x128xf32>
    %cst_68 = arith.constant dense<0.000000e+00> : vector<32x128xf32>
    %124 = tpu.matmul %122, %123, %cst_68 {dimension_numbers = #tpu.dot_dimension_numbers<[1], [0], [0], [1], [0, 0, 1, 1], [], []>} : vector<32x256xf32>, vector<256x128xf32>, vector<32x128xf32> -> vector<32x128xf32>
    %c0_69 = arith.constant 0 : index
    %c768 = arith.constant 768 : index
    %125 = vector.load %arg8[%c0_69, %c768] : memref<1x1024xf32, #tpu.memory_space<vmem>>, vector<1x128xf32>
    %126 = vector.broadcast %125 : vector<1x128xf32> to vector<32x128xf32>
    %127 = arith.addf %124, %126 : vector<32x128xf32>
    %cst_70 = arith.constant 0.000000e+00 : f32
    %128 = vector.broadcast %cst_70 : f32 to vector<32x128xf32>
    %129 = arith.maximumf %127, %128 : vector<32x128xf32>
    %130 = arith.addf %129, %116 : vector<32x128xf32>
    %131 = vector.shape_cast %130 : vector<32x128xf32> to vector<2x16x128xf32>
    %132 = vector.extract_strided_slice %131 {offsets = [0, 15, 0], sizes = [2, 1, 128], strides = [1, 1, 1]} : vector<2x16x128xf32> to vector<2x1x128xf32>
    %133 = vector.shape_cast %132 : vector<2x1x128xf32> to vector<2x128xf32>
    %c0_71 = arith.constant 0 : index
    %c0_72 = arith.constant 0 : index
    %134 = vector.load %arg7[%c0_71, %c0_72] : memref<128x12xf32, #tpu.memory_space<vmem>>, vector<128x12xf32>
    %cst_73 = arith.constant dense<0.000000e+00> : vector<2x12xf32>
    %135 = tpu.matmul %133, %134, %cst_73 {dimension_numbers = #tpu.dot_dimension_numbers<[1], [0], [0], [1], [0, 0, 1, 1], [], []>} : vector<2x128xf32>, vector<128x12xf32>, vector<2x12xf32> -> vector<2x12xf32>
    %c0_74 = arith.constant 0 : index
    %c896 = arith.constant 896 : index
    %136 = vector.load %arg8[%c0_74, %c896] : memref<1x1024xf32, #tpu.memory_space<vmem>>, vector<1x12xf32>
    %137 = vector.broadcast %136 : vector<1x12xf32> to vector<2x12xf32>
    %138 = arith.addf %135, %137 : vector<2x12xf32>
    %c0_75 = arith.constant 0 : index
    %c0_76 = arith.constant 0 : index
    %139 = vector.load %arg9[%c0_75, %c0_76] : memref<2x12xf32, #tpu.memory_space<vmem>>, vector<2x12xf32>
    tpu.vector_store %arg9[%c0_75, %c0_76], %138 {strides = array<i32>} : memref<2x12xf32, #tpu.memory_space<vmem>>, vector<2x12xf32>,
    return
  }
}

</mosaic_0001>

<bundles_post_ra>
// kernel: tpu_custom_call.1
= control target key start
LH: loop header
LB: loop body
LE: loop exit
PB: predicated region body
PF: predicated region fallthrough
CT: control target
= control target key end

     0   :  { %14 = vsyncpa [#allocation3], 0  ;;  %s2790_s0 = inlined_call_operand.vmem [shape: f32[32,8], index: 0, kind: input, shape index: {}]   ;;  %s2791_s1 = inlined_call_operand.hbm [shape: f32[2,8,64], index: 1, kind: input, shape index: {}]   ;;  %s2792_s2 = inlined_call_operand.vmem [shape: f32[2,32,32], index: 2, kind: input, shape index: {}]   ;;  %s2793_s3 = inlined_call_operand.hbm [shape: f32[2,32,128], index: 3, kind: input, shape index: {}]   ;;  %s2794_s4 = inlined_call_operand.vmem [shape: f32[2,64,64], index: 4, kind: input, shape index: {}]   ;;  %s2795_s5 = inlined_call_operand.hbm [shape: f32[2,64,256], index: 5, kind: input, shape index: {}]   ;;  %s2796_s6 = inlined_call_operand.hbm [shape: f32[256,128], index: 6, kind: input, shape index: {}]   ;;  %s2797_s7 = inlined_call_operand.vmem [shape: f32[128,12], index: 7, kind: input, shape index: {}]   ;;  %s2798_s8 = inlined_call_operand.hbm [shape: f32[1,1024], index: 8, kind: input, shape index: {}]   ;;  %s2799_s9 = inlined_call_operand.hbm [shape: f32[2,12], index: 9, kind: output, shape index: {}]  }
   0x1   :  { %15 = vsyncpa [#allocation6], 0 }
   0x2   :  { %16 = vsyncpa [#allocation9], 0 }
   0x3   :  { %17 = vsyncpa [#allocation4], 0  ;;  %s2347_s30 = smov [#allocation5]   ;;  %s2348_s11 = smov [#allocation8]  }
   0x4   :  { %s39_s10 = sshll.u32 %s2347_s30, 4  ;;  %s65_s12 = sshll.u32 %s2348_s11, 4  ;;  %s40_s10 = int_to_ptr.vmem [resolvable:$true] %s39_s10  ;;  %s2412_s12 = int_to_ptr.vmem [resolvable:$true] %s65_s12 }
   0x5   :  { %s2207_s15 = scalar_lea.hbm %s2793_s3, 1024 }
   0x6   :  { %p2208_p0 = scmp.ne.s32.totalorder %s2793_s3, %s2207_s15  ;;  %p2211_p1 = scmp.lt.u32.totalorder %s2207_s15, %s2793_s3 }
   0x8   :  { %p2213_p2 = pnand %p2211_p1, %p2208_p0 }
   0xa   :  { %2216 = shalt.err (!%p2213_p2)
}
   0xb   :  { %s2217_s20 = scalar_lea.vmem %s40_s10, 1024  ;;  %p2222_p4 = scmp.lt.s32.totalorder %s40_s10, %s40_s10 }
   0xc   :  { %p2218_p3 = scmp.ne.s32.totalorder %s40_s10, %s2217_s20  ;;  %p2223_p5 = scmp.lt.s32.totalorder %s2217_s20, %s2217_s20 }
   0xe   :  { %p2224_p6 = por %p2223_p5, %p2222_p4 }
  0x10   :  { %p2225_p7 = pnand %p2224_p6, %p2218_p3 }
  0x12   :  { %2228 = shalt.err (!%p2225_p7)
}
  0x13   :  { %s2349_s21 = smov 128   ;;  %s2350_s22 = smov 8  }
  0x14   :  { %45 = dma.hbm_to_vmem [thread:$0]  %s2793_s3, 1024, %s40_s10, [#allocation6], %s2349_s21, %s2349_s21, %s2350_s22  }
  0x15   :  { %s2229_s27 = scalar_lea.hbm %s2796_s6, 4096 }
  0x16   :  { %p2230_p8 = scmp.ne.s32.totalorder %s2796_s6, %s2229_s27  ;;  %p2233_p9 = scmp.lt.u32.totalorder %s2229_s27, %s2796_s6 }
  0x18   :  { %p2235_p10 = pnand %p2233_p9, %p2230_p8 }
  0x1a   :  { %2238 = shalt.err (!%p2235_p10)
}
  0x1b   :  { %s2239_s13 = scalar_lea.vmem %s2412_s12, 4096  ;;  %p2244_p12 = scmp.lt.s32.totalorder %s2412_s12, %s2412_s12 }
  0x1c   :  { %p2240_p11 = scmp.ne.s32.totalorder %s2412_s12, %s2239_s13  ;;  %p2245_p13 = scmp.lt.s32.totalorder %s2239_s13, %s2239_s13 }
  0x1e   :  { %p2246_p0 = por %p2245_p13, %p2244_p12 }
  0x20   :  { %p2247_p1 = pnand %p2246_p0, %p2240_p11 }
  0x22   :  { %2250 = shalt.err (!%p2247_p1)
}
  0x23   :  { %71 = dma.hbm_to_vmem [thread:$0]  %s2796_s6, 4096, %s2412_s12, [#allocation9], %s2349_s21, %s2349_s21, %s2350_s22  }
  0x24   :  { %s2351_s14 = smov [#allocation2]   ;;  %s2352_s16 = smov [#allocation7]  }
  0x25   :  { %s25_s15 = sshll.u32 %s2351_s14, 4  ;;  %s53_s17 = sshll.u32 %s2352_s16, 4  ;;  %s26_s15 = int_to_ptr.vmem [resolvable:$true] %s25_s15  ;;  %s2449_s17 = int_to_ptr.vmem [resolvable:$true] %s53_s17 }
  0x26   :  { %s2251_s20 = scalar_lea.hbm %s2791_s1, 256 }
  0x27   :  { %p2252_p2 = scmp.ne.s32.totalorder %s2791_s1, %s2251_s20  ;;  %p2255_p3 = scmp.lt.u32.totalorder %s2251_s20, %s2791_s1 }
  0x29   :  { %p2257_p4 = pnand %p2255_p3, %p2252_p2 }
  0x2b   :  { %2260 = shalt.err (!%p2257_p4)
}
  0x2c   :  { %s2261_s6 = scalar_lea.vmem %s26_s15, 256  ;;  %p2266_p6 = scmp.lt.s32.totalorder %s26_s15, %s26_s15 }
  0x2d   :  { %p2262_p5 = scmp.ne.s32.totalorder %s26_s15, %s2261_s6  ;;  %p2267_p7 = scmp.lt.s32.totalorder %s2261_s6, %s2261_s6 }
  0x2f   :  { %p2268_p8 = por %p2267_p7, %p2266_p6 }
  0x31   :  { %p2269_p9 = pnand %p2268_p8, %p2262_p5 }
  0x33   :  { %2272 = shalt.err (!%p2269_p9)
}
  0x34   :  { %31 = dma.hbm_to_vmem [thread:$0]  %s2791_s1, 256, %s26_s15, [#allocation3], %s2349_s21, %s2349_s21, %s2350_s22  }
  0x35   :  { %s2273_s30 = scalar_lea.hbm %s2795_s5, 4096 }
  0x36   :  { %p2274_p10 = scmp.ne.s32.totalorder %s2795_s5, %s2273_s30  ;;  %p2277_p11 = scmp.lt.u32.totalorder %s2273_s30, %s2795_s5 }
  0x38   :  { %p2279_p12 = pnand %p2277_p11, %p2274_p10 }
  0x3a   :  { %2282 = shalt.err (!%p2279_p12)
}
  0x3b   :  { %s2283_s14 = scalar_lea.vmem %s2449_s17, 4096  ;;  %p2288_p0 = scmp.lt.s32.totalorder %s2449_s17, %s2449_s17 }
  0x3c   :  { %p2284_p13 = scmp.ne.s32.totalorder %s2449_s17, %s2283_s14  ;;  %p2289_p1 = scmp.lt.s32.totalorder %s2283_s14, %s2283_s14 }
  0x3e   :  { %p2290_p2 = por %p2289_p1, %p2288_p0 }
  0x40   :  { %p2291_p3 = pnand %p2290_p2, %p2284_p13 }
  0x42   :  { %2294 = shalt.err (!%p2291_p3)
}
  0x43   :  { %s2353_s1 = smov 256   ;;  %s2354_s21 = smov 16  }
  0x44   :  { %59 = dma.hbm_to_vmem [thread:$0]  %s2795_s5, 4096, %s2449_s17, [#allocation6], %s2353_s1, %s2353_s1, %s2354_s21  }
  0x45   :  { %s2355_s16 = smov [#allocation10]   ;;  %s2295_s23 = scalar_lea.hbm %s2798_s8, 128 }
  0x46   :  { %s80_s18 = sshll.u32 %s2355_s16, 4  ;;  %p2296_p4 = scmp.ne.s32.totalorder %s2798_s8, %s2295_s23  ;;  %s81_s18 = int_to_ptr.vmem [resolvable:$true] %s80_s18 }
  0x47   :  { %p2299_p5 = scmp.lt.u32.totalorder %s2295_s23, %s2798_s8 }
  0x49   :  { %p2301_p6 = pnand %p2299_p5, %p2296_p4 }
  0x4b   :  { %2304 = shalt.err (!%p2301_p6)
}
  0x4c   :  { %s2305_s12 = scalar_lea.vmem %s81_s18, 128  ;;  %p2310_p8 = scmp.lt.s32.totalorder %s81_s18, %s81_s18 }
  0x4d   :  { %p2306_p7 = scmp.ne.s32.totalorder %s81_s18, %s2305_s12  ;;  %p2311_p9 = scmp.lt.s32.totalorder %s2305_s12, %s2305_s12 }
  0x4f   :  { %p2312_p10 = por %p2311_p9, %p2310_p8 }
  0x51   :  { %p2313_p11 = pnand %p2312_p10, %p2306_p7 }
  0x53   :  { %2316 = shalt.err (!%p2313_p11)
}
  0x54   :  { %83 = dma.hbm_to_vmem [thread:$0]  %s2798_s8, 128, %s81_s18, [#allocation9]  }
  0x55   :  { %2339 = dma.done.wait [#allocation3], 256  }
  0x56   :  { %2340 = vsyncadd [#allocation3], 4294967040 }
  0x57   :  { %2341 = dma.done.wait [#allocation6], 5120  }
  0x58   :  { %2342 = vsyncadd [#allocation6], 4294962176 }
  0x59   :  { %2343 = dma.done.wait [#allocation9], 4224  }
  0x5a   :  { %2344 = vsyncadd [#allocation9], 4294963072  ;;  %v99_v0 = vlaneseq  ;;  %vm184_vm0 = vcmask 64512   ;;  %v183_v4 = vld [vmem:[#allocation2 + $0x8] sm:$0xff]  ;;  %v152_v5 = vld [vmem:[%s2790_s0] sm:$0xff]  ;;  %vm415_vm4 = vcmask 261120  }
  0x5b   :  { %v153_v6 = vld [vmem:[%s2790_s0 + $0x8] sm:$0xff]  ;;  %1869 = vmatprep.subr.mxu0 %v183_v4  ;;  %v160_v7 = vrot.slane %v152_v5, 7  ;;  %1871 = vmatprep.mubr.msk.f32.mxu0 %vm184_vm0, %v152_v5  ;;  %v181_v8 = vld [vmem:[#allocation2] sm:$0xff]  ;;  %v155_v10 = vld [vmem:[%s2790_s0 + $0x18] sm:$0xff]  ;;  %s2356_s12 = smov 96   ;;  %s2357_s25 = smov 64  }
  0x5c   :  { %v2495_v1 = vshrl.u32 %v99_v0, 7  ;;  %v154_v9 = vld [vmem:[%s2790_s0 + $0x10] sm:$0xff]  ;;  %1870 = vmatpush3.msra.mxu0 %v183_v4  ;;  %v163_v12 = vrot.slane %v155_v10, 7  ;;  %v1691_v14 = vld [vmem:[%s2792_s2 + $0x20] sm:$0xff]  ;;  %v1692_v15 = vld [vmem:[%s2792_s2 + $0x28] sm:$0xff]  ;;  %v161_v17 = vrot.slane %v153_v6, 7 }
  0x5d   :  { %v162_v11 = vrot.slane %v154_v9, 7  ;;  %1872 = vmatmul.mubr.msk.f32.vlgmr.msra.gmra.mrb[0].mxu0 %vm184_vm0, %v153_v6  ;;  %1877 = vmatprep.subr.mxu0 %v181_v8  ;;  %v2020_v16 = vpack.c.bf16 %v1692_v15, %v1691_v14  ;;  %v1693_v24 = vld [vmem:[%s2792_s2 + $0x30] sm:$0xff]  ;;  %v1694_v25 = vld [vmem:[%s2792_s2 + $0x38] sm:$0xff]  ;;  %v406_v27 = vld [vmem:[%s2792_s2] sm:$0xff]  ;;  %vm917_vm8 = vcmask 523264   ;;  %vm2360_vm12 = vmmov 0  }
  0x5e   :  { %v2498_v2 = vand.u32 15, %v2495_v1  ;;  %v102_v3 = vadd.s32 16, %v2495_v1  ;;  %vm164_vm1 = vcmp.lt.s32.totalorder %v2495_v1, 1  ;;  %1878 = vmatpush3.msra.mxu0 %v181_v8  ;;  %1874 = vmatprep.mubr.msk.f32.mxu0 %vm184_vm0, %v154_v9  ;;  %v2024_v26 = vpack.c.bf16 %v1694_v25, %v1693_v24  ;;  %v407_v28 = vld [vmem:[%s2792_s2 + $0x8] sm:$0xff]  ;;  %v1690_v30 = vld [vmem:[#allocation10] ss:$0 sm:$0xff] }
  0x5f   :  { %v168_v18 = vsel %vm164_vm1, %v163_v12, %v160_v7  ;;  %2021 = vmatprep.subr.bf16.mxu1 %v2020_v16  ;;  %v166_v20 = vsel %vm164_vm1, %v161_v17, %v162_v11  ;;  %v167_v21 = vsel %vm164_vm1, %v160_v7, %v161_v17  ;;  %v165_v23 = vsel %vm164_vm1, %v162_v11, %v163_v12  ;;  %v408_v35 = vld [vmem:[%s2792_s2 + $0x10] sm:$0xff]  ;;  %v409_v36 = vld [vmem:[%s2792_s2 + $0x18] sm:$0xff]  ;;  %v675_v56 = vld [vmem:[#allocation5 + $0x20] sm:$0xff] }
  0x60   :  { %vm156_vm2 = vcmp.ge.s32.totalorder %v2498_v2, 1  ;;  %v2516_v13 = vand.u32 15, %v102_v3  ;;  %2023 = vmatpush3.bf16.msra.mxu1 %v2020_v16  ;;  %v2028_v29 = vpack.c.bf16 %v407_v28, %v406_v27  ;;  %v2032_v43 = vpack.c.bf16 %v409_v36, %v408_v35  ;;  %v676_v57 = vld [vmem:[#allocation5 + $0x28] sm:$0xff]  ;;  %v677_v59 = vld [vmem:[#allocation5 + $0x30] sm:$0xff]  ;;  %v678_v60 = vld [vmem:[#allocation5 + $0x38] sm:$0xff] }
  0x61   :  { %v177_v19 = vsel %vm156_vm2, %v168_v18, 0.0  ;;  %1875 = vmatmul.mubr.msk.f32.gmra.mrb[2].mxu0 %vm184_vm0, %v155_v10  ;;  %2025 = vmatprep.subr.bf16.mxu1 %v2024_v26  ;;  %v2036_v58 = vpack.c.bf16 %v676_v57, %v675_v56  ;;  %v2040_v61 = vpack.c.bf16 %v678_v60, %v677_v59  ;;  %v670_v62 = vld [vmem:[#allocation5] sm:$0xff]  ;;  %v671_v63 = vld [vmem:[#allocation5 + $0x8] sm:$0xff]  ;;  %v1715_v5 = vld [vmem:[%s2794_s4 + $0x50] sm:$0xff]  ;;  %vm653_vm5 = vcmp.lt.s32.totalorder %v2495_v1, 2 }
  0x62   :  { %vm158_vm3 = vcmp.ge.s32.totalorder %v2516_v13, 1  ;;  %1879 = vmatprep.mubr.msk.f32.mxu0 %vm184_vm0, %v177_v19  ;;  %v2044_v0 = vpack.c.bf16 %v671_v63, %v670_v62  ;;  %v1713_v3 = vld [vmem:[%s2794_s4 + $0x40] sm:$0xff]  ;;  %v1714_v4 = vld [vmem:[%s2794_s4 + $0x48] sm:$0xff]  ;;  %v1716_v7 = vld [vmem:[%s2794_s4 + $0x58] sm:$0xff]  ;;  %vm645_vm6 = vcmp.ge.s32.totalorder %v2498_v2, 2  ;;  %vm647_vm7 = vcmp.ge.s32.totalorder %v2516_v13, 2 }
  0x63   :  { %v179_v22 = vsel %vm158_vm3, %v166_v20, 0.0  ;;  %2037 = vmatprep.subr.bf16.mxu0 %v2036_v58  ;;  %v2052_v6 = vpack.c.bf16 %v1714_v4, %v1713_v3  ;;  %v2056_v8 = vpack.c.bf16 %v1716_v7, %v1715_v5  ;;  %v1717_v9 = vld [vmem:[%s2794_s4 + $0x60] sm:$0xff]  ;;  %v1718_v10 = vld [vmem:[%s2794_s4 + $0x68] sm:$0xff]  ;;  %v672_v24 = vld [vmem:[#allocation5 + $0x10] sm:$0xff]  ;;  %vm1155_vm9 = vcmp.lt.s32.totalorder %v2495_v1, 4 }
  0x64   :  { %2027 = vmatpush3.bf16.msra.mxu1 %v2024_v26  ;;  %v2060_v11 = vpack.c.bf16 %v1718_v10, %v1717_v9  ;;  %v1703_v14 = vld [vmem:[#allocation10 + $0x1] ss:$0 sm:$0xff]  ;;  %v673_v25 = vld [vmem:[#allocation5 + $0x18] sm:$0xff]  ;;  %v1191_v57 = vld [vmem:[#allocation7 + $0x90] sm:$0xff]  ;;  %vm1147_vm10 = vcmp.ge.s32.totalorder %v2498_v2, 4  ;;  %vm1149_vm11 = vcmp.ge.s32.totalorder %v2516_v13, 4 }
  0x65   :  { %1880 = vmatmul.mubr.msk.f32.vlgmr.msra.gmra.mrb[0].mxu0 %vm184_vm0, %v167_v21  ;;  %2029 = vmatprep.subr.bf16.mxu1 %v2028_v29  ;;  %v1196_v59 = vld [vmem:[#allocation7 + $0xb8] sm:$0xff]  ;;  %v1193_v62 = vld [vmem:[#allocation7 + $0xa0] sm:$0xff]  ;;  %v1195_v63 = vld [vmem:[#allocation7 + $0xb0] sm:$0xff]  ;;  %vm1590_vm13 = vcmask 1041409   ;;  %vm1663_vm14 = vcmask 91136  }
  0x66   :  { %1882 = vmatprep.mubr.msk.f32.mxu0 %vm184_vm0, %v179_v22  ;;  %2039 = vmatpush3.bf16.msra.mxu0 %v2036_v58  ;;  %v1194_v58 = vld [vmem:[#allocation7 + $0xa8] sm:$0xff]  ;;  %v2090_v3 = vpack.c.bf16 %v1195_v63, %v1193_v62  ;;  %v903_v9 = vld [vmem:[%s2794_s4 + $0x18] sm:$0xff]  ;;  %v1569_v2 = vld [vmem:[%s2797_s7 + $0x30] sm:$0xff] }
  0x67   :  { %2041 = vmatprep.subr.bf16.mxu0 %v2040_v61  ;;  %v1177_v62 = vld [vmem:[#allocation7 + $0x28] sm:$0xff]  ;;  %v1179_v63 = vld [vmem:[#allocation7 + $0x38] sm:$0xff] }
  0x68   :  { %v1570_v13 = vld [vmem:[%s2797_s7 + $0x38] sm:$0xff] }
  0x69   :  { %1883 = vmatmul.mubr.msk.f32.gmra.mrb[2].mxu0 %vm184_vm0, %v165_v23 }
  0x6a   :  { %2043 = vmatpush3.bf16.msra.mxu0 %v2040_v61  ;;  %v2088_v61 = vpack.c.bf16 %v1196_v59, %v1194_v58  ;;  %v1172_v58 = vld [vmem:[#allocation7] sm:$0xff]  ;;  %v1174_v59 = vld [vmem:[#allocation7 + $0x10] sm:$0xff] }
  0x6b   :  { %2045 = vmatprep.subr.bf16.mxu0 %v2044_v0 }
 0x138   :  { %v1881_v31 = vpop.f32.mrb[0].mxu0 }
 0x139   :  { %v387_v32 = vadd.f32 %v1881_v31, %v1690_v30  ;;  %v360_v33 = vpop.f32.mrb[1].mxu0 }
 0x13a   :  { %v386_v34 = vadd.f32 %v1690_v30, %v360_v33  ;;  %v2048_v33 = vpack.c.bf16 %v673_v25, %v672_v24 }
 0x13b   :  { %v391_v37 = vmax.f32 %v387_v32, 0.0 }
 0x13c   :  { %629 = vrot.lane.b32.xlu0 %v386_v34, %s2356_s12  ;;  %v1884_v38 = vpop.f32.mrb[2].mxu0  ;;  %v390_v39 = vmax.f32 %v386_v34, 0.0 }
 0x13d   :  { %v395_v40 = vrot.slane %v391_v37, 7  ;;  %v389_v41 = vadd.f32 %v1884_v38, %v1690_v30  ;;  %v370_v42 = vpop.f32.mrb[3].mxu0 }
 0x13e   :  { %v388_v44 = vadd.f32 %v1690_v30, %v370_v42  ;;  %v394_v45 = vrot.slane %v390_v39, 7  ;;  %1893 = vmatprep.mubr.msk.f32.mxu1 %vm415_vm4, %v390_v39 }
 0x13f   :  { %v393_v46 = vmax.f32 %v389_v41, 0.0  ;;  %1894 = vmatmul.mubr.msk.f32.vlgmr.msra.gmra.mrb[0].mxu1 %vm415_vm4, %v391_v37 }
 0x140   :  { %v392_v47 = vmax.f32 %v388_v44, 0.0  ;;  %v400_v48 = vsel %vm164_vm1, %v394_v45, %v395_v40  ;;  %631 = vrot.lane.b32.xlu0 %v387_v32, %s2356_s12  ;;  %2031 = vmatpush3.bf16.msra.mxu1 %v2028_v29 }
 0x141   :  { %v397_v49 = vrot.slane %v393_v46, 7  ;;  %633 = vrot.lane.b32.xlu1 %v388_v44, %s2356_s12  ;;  %2033 = vmatprep.subr.bf16.mxu1 %v2032_v43 }
 0x142   :  { %v396_v50 = vrot.slane %v392_v47, 7  ;;  %1896 = vmatprep.mubr.msk.f32.mxu1 %vm415_vm4, %v392_v47  ;;  %v1719_v47 = vld [vmem:[%s2794_s4 + $0x70] sm:$0xff] }
 0x143   :  { %1897 = vmatmul.mubr.msk.f32.gmra.mrb[2].mxu1 %vm415_vm4, %v393_v46  ;;  %v401_v51 = vsel %vm164_vm1, %v397_v49, %v394_v45 }
 0x144   :  { %2035 = vmatpush3.bf16.msra.mxu1 %v2032_v43  ;;  %v402_v52 = vsel %vm156_vm2, %v401_v51, 0.0  ;;  %v399_v53 = vsel %vm164_vm1, %v395_v40, %v396_v50  ;;  %v398_v54 = vsel %vm164_vm1, %v396_v50, %v397_v49  ;;  %v900_v50 = vld [vmem:[%s2794_s4] sm:$0xff]  ;;  %v901_v51 = vld [vmem:[%s2794_s4 + $0x8] sm:$0xff] }
 0x145   :  { %635 = vrot.lane.b32.xlu1 %v389_v41, %s2356_s12  ;;  %1907 = vmatprep.mubr.msk.f32.mxu1 %vm415_vm4, %v402_v52  ;;  %v404_v55 = vsel %vm158_vm3, %v399_v53, 0.0  ;;  %v2068_v52 = vpack.c.bf16 %v901_v51, %v900_v50  ;;  %v1190_v53 = vld [vmem:[#allocation7 + $0x88] sm:$0xff]  ;;  %v2358_v51 = vmov 0.0  }
 0x146   :  { %2053 = vmatprep.subr.bf16.mxu1 %v2052_v6 }
 0x147   :  { %1908 = vmatmul.mubr.msk.f32.vlgmr.msra.gmra.mrb[0].mxu1 %vm415_vm4, %v400_v48  ;;  %v1720_v48 = vld [vmem:[%s2794_s4 + $0x78] sm:$0xff] }
 0x148   :  { %1910 = vmatprep.mubr.msk.f32.mxu1 %vm415_vm4, %v404_v55  ;;  %2055 = vmatpush3.bf16.msra.mxu1 %v2052_v6  ;;  %v2064_v49 = vpack.c.bf16 %v1720_v48, %v1719_v47  ;;  %v1189_v55 = vld [vmem:[#allocation7 + $0x80] sm:$0xff]  ;;  %v1173_v48 = vld [vmem:[#allocation7 + $0x8] sm:$0xff] }
 0x149   :  { %2057 = vmatprep.subr.bf16.mxu1 %v2056_v8  ;;  %v2086_v60 = vpack.c.bf16 %v1191_v57, %v1189_v55 }
 0x14b   :  { %1911 = vmatmul.mubr.msk.f32.gmra.mrb[2].mxu1 %vm415_vm4, %v398_v54  ;;  %v1192_v54 = vld [vmem:[#allocation7 + $0x98] sm:$0xff] }
 0x14c   :  { %2059 = vmatpush3.bf16.msra.mxu1 %v2056_v8  ;;  %v2084_v56 = vpack.c.bf16 %v1192_v54, %v1190_v53  ;;  %v902_v8 = vld [vmem:[%s2794_s4 + $0x10] sm:$0xff] }
 0x14d   :  { %2061 = vmatprep.subr.bf16.mxu1 %v2060_v11 }
 0x150   :  { %2063 = vmatpush3.bf16.msra.mxu1 %v2060_v11 }
 0x151   :  { %2065 = vmatprep.subr.bf16.mxu1 %v2064_v49 }
 0x154   :  { %2067 = vmatpush3.bf16.msra.mxu1 %v2064_v49  ;;  %v1175_v49 = vld [vmem:[#allocation7 + $0x18] sm:$0xff] }
 0x155   :  { %2069 = vmatprep.subr.bf16.mxu1 %v2068_v52  ;;  %v2100_v50 = vpack.c.bf16 %v1175_v49, %v1173_v48  ;;  %v1455_v49 = vld [vmem:[#allocation8 + $0x90] sm:$0xff] }
 0x1ae   :  { %v630_v12 = vpop.permute.xlu0 %629 }
 0x1b2   :  { %v632_v21 = vpop.permute.xlu0 %631 }
 0x1b3   :  { %v634_v18 = vpop.permute.xlu1 %633 }
 0x1b7   :  { %v636_v34 = vpop.permute.xlu1 %635 }
 0x21a   :  { %v1909_v15 = vpop.f32.mrb[0].mxu1 }
 0x21b   :  { %v618_v16 = vadd.f32 %v1909_v15, %v1703_v14  ;;  %v591_v17 = vpop.f32.mrb[1].mxu1 }
 0x21c   :  { %v617_v19 = vadd.f32 %v1703_v14, %v591_v17  ;;  %v2072_v17 = vpack.c.bf16 %v903_v9, %v902_v8 }
 0x21d   :  { %v622_v20 = vmax.f32 %v618_v16, 0.0 }
 0x21e   :  { %v621_v22 = vmax.f32 %v617_v19, 0.0  ;;  %v1912_v23 = vpop.f32.mrb[2].mxu1 }
 0x21f   :  { %v642_v26 = vadd.f32 %v632_v21, %v622_v20  ;;  %v620_v27 = vadd.f32 %v1912_v23, %v1703_v14  ;;  %v601_v28 = vpop.f32.mrb[3].mxu1  ;;  %v904_v20 = vld [vmem:[%s2794_s4 + $0x20] sm:$0xff]  ;;  %v905_v21 = vld [vmem:[%s2794_s4 + $0x28] sm:$0xff] }
 0x220   :  { %v641_v29 = vadd.f32 %v630_v12, %v621_v22  ;;  %v619_v30 = vadd.f32 %v1703_v14, %v601_v28  ;;  %v906_v28 = vld [vmem:[%s2794_s4 + $0x30] sm:$0xff] }
 0x221   :  { %v650_v31 = vrot.slane %v642_v26, 6  ;;  %v624_v32 = vmax.f32 %v620_v27, 0.0 }
 0x222   :  { %v649_v35 = vrot.slane %v641_v29, 6  ;;  %v623_v36 = vmax.f32 %v619_v30, 0.0  ;;  %1921 = vmatprep.mubr.msk.f32.mxu0 %vm415_vm4, %v641_v29  ;;  %v907_v29 = vld [vmem:[%s2794_s4 + $0x38] sm:$0xff] }
 0x223   :  { %v644_v37 = vadd.f32 %v636_v34, %v624_v32  ;;  %1922 = vmatmul.mubr.msk.f32.vlgmr.msra.gmra.mrb[4].mxu0 %vm415_vm4, %v642_v26  ;;  %v2076_v26 = vpack.c.bf16 %v905_v21, %v904_v20  ;;  %v2080_v34 = vpack.c.bf16 %v907_v29, %v906_v28 }
 0x224   :  { %v643_v38 = vadd.f32 %v634_v18, %v623_v36  ;;  %2047 = vmatpush3.bf16.msra.mxu0 %v2044_v0  ;;  %v656_v39 = vsel %vm653_vm5, %v649_v35, %v650_v31  ;;  %v1712_v0 = vld [vmem:[#allocation10 + $0x2] ss:$0 sm:$0xff]  ;;  %v1198_v36 = vld [vmem:[#allocation7 + $0xc8] sm:$0xff] }
 0x225   :  { %v652_v40 = vrot.slane %v644_v37, 6  ;;  %2049 = vmatprep.subr.bf16.mxu0 %v2048_v33 }
 0x226   :  { %v651_v41 = vrot.slane %v643_v38, 6  ;;  %1924 = vmatprep.mubr.msk.f32.mxu0 %vm415_vm4, %v643_v38 }
 0x227   :  { %1925 = vmatmul.mubr.msk.f32.gmra.mrb[6].mxu0 %vm415_vm4, %v644_v37  ;;  %v657_v42 = vsel %vm653_vm5, %v652_v40, %v649_v35  ;;  %v1200_v37 = vld [vmem:[#allocation7 + $0xd8] sm:$0xff] }
 0x228   :  { %2051 = vmatpush3.bf16.msra.mxu0 %v2048_v33  ;;  %v666_v43 = vsel %vm645_vm6, %v657_v42, 0.0  ;;  %v655_v44 = vsel %vm653_vm5, %v650_v31, %v651_v41  ;;  %v654_v45 = vsel %vm653_vm5, %v651_v41, %v652_v40  ;;  %v2092_v38 = vpack.c.bf16 %v1200_v37, %v1198_v36  ;;  %v1199_v40 = vld [vmem:[#allocation7 + $0xd0] sm:$0xff]  ;;  %v1202_v42 = vld [vmem:[#allocation7 + $0xe8] sm:$0xff]  ;;  %v1184_v36 = vld [vmem:[#allocation7 + $0x60] sm:$0xff] }
 0x229   :  { %1935 = vmatprep.mubr.msk.f32.mxu0 %vm415_vm4, %v666_v43  ;;  %v668_v46 = vsel %vm647_vm7, %v655_v44, 0.0  ;;  %2085 = vmatprep.subr.bf16.mxu0 %v2084_v56  ;;  %v1204_v43 = vld [vmem:[#allocation7 + $0xf8] sm:$0xff]  ;;  %v1186_v37 = vld [vmem:[#allocation7 + $0x70] sm:$0xff] }
 0x22a   :  { %v2096_v44 = vpack.c.bf16 %v1204_v43, %v1202_v42  ;;  %v1453_v43 = vld [vmem:[#allocation8 + $0x80] sm:$0xff] }
 0x22b   :  { %1936 = vmatmul.mubr.msk.f32.vlgmr.msra.gmra.mrb[4].mxu0 %vm415_vm4, %v656_v39  ;;  %v1197_v39 = vld [vmem:[#allocation7 + $0xc0] sm:$0xff] }
 0x22c   :  { %1938 = vmatprep.mubr.msk.f32.mxu0 %vm415_vm4, %v668_v46  ;;  %2087 = vmatpush1.bf16.msra.mxu0 %v2086_v60  ;;  %v2094_v41 = vpack.c.bf16 %v1199_v40, %v1197_v39  ;;  %v1203_v46 = vld [vmem:[#allocation7 + $0xf0] sm:$0xff]  ;;  %v2114_v40 = vpack.c.bf16 %v1186_v37, %v1184_v36  ;;  %v1566_v36 = vld [vmem:[%s2797_s7 + $0x18] sm:$0xff] }
 0x22d   :  { %2089 = vmatprep.subr.bf16.mxu0 %v2088_v61 }
 0x22f   :  { %1939 = vmatmul.mubr.msk.f32.gmra.mrb[6].mxu0 %vm415_vm4, %v654_v45  ;;  %v1201_v45 = vld [vmem:[#allocation7 + $0xe0] sm:$0xff] }
 0x230   :  { %2091 = vmatpush1.bf16.msra.mxu0 %v2090_v3  ;;  %v2098_v47 = vpack.c.bf16 %v1203_v46, %v1201_v45  ;;  %1281 = vmatprep.mubr.f32.mxu0 %v2358_v51  ;;  %v1437_v45 = vld [vmem:[#allocation8] sm:$0xff] }
 0x231   :  { %2093 = vmatprep.subr.bf16.mxu0 %v2092_v38 }
 0x234   :  { %2095 = vmatpush1.bf16.msra.mxu0 %v2094_v41 }
 0x235   :  { %2097 = vmatprep.subr.bf16.mxu0 %v2096_v44  ;;  %v1454_v44 = vld [vmem:[#allocation8 + $0x88] sm:$0xff] }
 0x236   :  { %v2116_v46 = vpack.c.bf16 %v1454_v44, %v1453_v43  ;;  %v1403_v43 = vld [vmem:[#allocation10 + $0x4] sm:$0x3]  ;;  %v1411_v44 = vsub.s32 1, %v2495_v1 }
 0x238   :  { %2099 = vmatpush1.bf16.msra.mxu0 %v2098_v47  ;;  %v1438_v47 = vld [vmem:[#allocation8 + $0x8] sm:$0xff] }
 0x239   :  { %2101 = vmatprep.subr.bf16.mxu0 %v2100_v50  ;;  %v2118_v48 = vpack.c.bf16 %v1438_v47, %v1437_v45  ;;  %v1456_v50 = vld [vmem:[#allocation8 + $0x98] sm:$0xff] }
 0x2fe   :  { %v1937_v4 = vpop.f32.mrb[4].mxu0 }
 0x2ff   :  { %v881_v5 = vadd.f32 %v1937_v4, %v1712_v0  ;;  %v854_v6 = vpop.f32.mrb[5].mxu0 }
 0x300   :  { %v880_v7 = vadd.f32 %v1712_v0, %v854_v6 }
 0x301   :  { %v885_v10 = vmax.f32 %v881_v5, 0.0  ;;  %1133 = vrot.lane.b32.xlu1 %v881_v5, %s2357_s25 }
 0x302   :  { %v884_v11 = vmax.f32 %v880_v7, 0.0  ;;  %1131 = vrot.lane.b32.xlu0 %v880_v7, %s2357_s25  ;;  %v1940_v12 = vpop.f32.mrb[6].mxu0  ;;  %v2102_v7 = vpack.c.bf16 %v1174_v59, %v1172_v58  ;;  %v1441_v58 = vld [vmem:[#allocation8 + $0x20] sm:$0xff] }
 0x303   :  { %v889_v14 = vrot.slane %v885_v10, 6  ;;  %v883_v15 = vadd.f32 %v1940_v12, %v1712_v0  ;;  %v864_v16 = vpop.f32.mrb[7].mxu0  ;;  %v1178_v12 = vld [vmem:[#allocation7 + $0x30] sm:$0xff] }
 0x304   :  { %v888_v18 = vrot.slane %v884_v11, 6  ;;  %v882_v19 = vadd.f32 %v1712_v0, %v864_v16  ;;  %1957 = vmatprep.mubr.msk.f32.mxu1 %vm917_vm8, %v884_v11  ;;  %v1176_v11 = vld [vmem:[#allocation7 + $0x20] sm:$0xff]  ;;  %v1181_v16 = vld [vmem:[#allocation7 + $0x48] sm:$0xff] }
 0x305   :  { %v887_v22 = vmax.f32 %v883_v15, 0.0  ;;  %1958 = vmatmul.mubr.msk.f32.vlgmr.msra.gmra.mrb[4].mxu1 %vm917_vm8, %v885_v10  ;;  %1137 = vrot.lane.b32.xlu1 %v883_v15, %s2357_s25  ;;  %v2104_v10 = vpack.c.bf16 %v1179_v63, %v1177_v62  ;;  %v1459_v62 = vld [vmem:[#allocation8 + $0xb0] sm:$0xff]  ;;  %v1460_v63 = vld [vmem:[#allocation8 + $0xb8] sm:$0xff] }
 0x306   :  { %v886_v23 = vmax.f32 %v882_v19, 0.0  ;;  %2071 = vmatpush3.bf16.msra.mxu1 %v2068_v52  ;;  %1135 = vrot.lane.b32.xlu0 %v882_v19, %s2357_s25  ;;  %v894_v24 = vsel %vm653_vm5, %v888_v18, %v889_v14  ;;  %v1729_v52 = vld [vmem:[#allocation10 + $0x3] ss:$0 sm:$0xff] }
 0x307   :  { %v891_v25 = vrot.slane %v887_v22, 6  ;;  %2073 = vmatprep.subr.bf16.mxu1 %v2072_v17 }
 0x308   :  { %v890_v27 = vrot.slane %v886_v23, 6  ;;  %1960 = vmatprep.mubr.msk.f32.mxu1 %vm917_vm8, %v886_v23  ;;  %v2106_v23 = vpack.c.bf16 %v1178_v12, %v1176_v11  ;;  %v1463_v12 = vld [vmem:[#allocation8 + $0xd0] sm:$0xff] }
 0x309   :  { %1961 = vmatmul.mubr.msk.f32.gmra.mrb[6].mxu1 %vm917_vm8, %v887_v22  ;;  %v895_v30 = vsel %vm653_vm5, %v891_v25, %v888_v18 }
 0x30a   :  { %2075 = vmatpush3.bf16.msra.mxu1 %v2072_v17  ;;  %v896_v31 = vsel %vm645_vm6, %v895_v30, 0.0  ;;  %v893_v32 = vsel %vm653_vm5, %v889_v14, %v890_v27  ;;  %v892_v33 = vsel %vm653_vm5, %v890_v27, %v891_v25  ;;  %v1183_v17 = vld [vmem:[#allocation7 + $0x58] sm:$0xff]  ;;  %v1182_v27 = vld [vmem:[#allocation7 + $0x50] sm:$0xff]  ;;  %v1185_v30 = vld [vmem:[#allocation7 + $0x68] sm:$0xff] }
 0x30b   :  { %1979 = vmatprep.mubr.msk.f32.mxu1 %vm917_vm8, %v896_v31  ;;  %2077 = vmatprep.subr.bf16.mxu1 %v2076_v26  ;;  %v898_v35 = vsel %vm647_vm7, %v893_v32, 0.0  ;;  %v2108_v25 = vpack.c.bf16 %v1183_v17, %v1181_v16  ;;  %v1187_v31 = vld [vmem:[#allocation7 + $0x78] sm:$0xff]  ;;  %v1447_v16 = vld [vmem:[#allocation8 + $0x50] sm:$0xff] }
 0x30c   :  { %v1448_v17 = vld [vmem:[#allocation8 + $0x58] sm:$0xff] }
 0x30e   :  { %2079 = vmatpush3.bf16.msra.mxu1 %v2076_v26  ;;  %v1180_v26 = vld [vmem:[#allocation7 + $0x40] sm:$0xff] }
 0x30f   :  { %2081 = vmatprep.subr.bf16.mxu1 %v2080_v34 }
 0x312   :  { %2083 = vmatpush3.bf16.msra.mxu1 %v2080_v34 }
 0x313   :  { %2117 = vmatprep.subr.bf16.mxu1 %v2116_v46 }
 0x315   :  { %1980 = vmatmul.mubr.msk.f32.vlgmr.msra.gmra.mrb[4].mxu1 %vm917_vm8, %v894_v24 }
 0x316   :  { %1982 = vmatprep.mubr.msk.f32.mxu1 %vm917_vm8, %v898_v35  ;;  %v2112_v35 = vpack.c.bf16 %v1187_v31, %v1185_v30  ;;  %2119 = vmatpush3.bf16.msra.mxu1 %v2118_v48  ;;  %v1563_v31 = vld [vmem:[%s2797_s7] sm:$0xff] }
 0x319   :  { %1983 = vmatmul.mubr.msk.f32.gmra.mrb[6].mxu1 %vm917_vm8, %v892_v33  ;;  %v2110_v33 = vpack.c.bf16 %v1182_v27, %v1180_v26  ;;  %v1468_v26 = vld [vmem:[#allocation8 + $0xf8] sm:$0xff] }
 0x373   :  { %v1134_v56 = vpop.permute.xlu1 %1133 }
 0x374   :  { %v1132_v60 = vpop.permute.xlu0 %1131 }
 0x377   :  { %v1138_v18 = vpop.permute.xlu1 %1137 }
 0x378   :  { %v1136_v21 = vpop.permute.xlu0 %1135 }
 0x3e8   :  { %v1981_v53 = vpop.f32.mrb[4].mxu1 }
 0x3e9   :  { %v1120_v54 = vadd.f32 %v1981_v53, %v1729_v52  ;;  %v1093_v55 = vpop.f32.mrb[5].mxu1  ;;  %v1439_v53 = vld [vmem:[#allocation8 + $0x10] sm:$0xff] }
 0x3ea   :  { %v1119_v57 = vadd.f32 %v1729_v52, %v1093_v55 }
 0x3eb   :  { %v1124_v61 = vmax.f32 %v1120_v54, 0.0  ;;  %v1440_v54 = vld [vmem:[#allocation8 + $0x18] sm:$0xff] }
 0x3ec   :  { %v1123_v0 = vmax.f32 %v1119_v57, 0.0  ;;  %v1984_v3 = vpop.f32.mrb[6].mxu1  ;;  %v2122_v55 = vpack.c.bf16 %v1440_v54, %v1439_v53  ;;  %v1458_v57 = vld [vmem:[#allocation8 + $0xa8] sm:$0xff] }
 0x3ed   :  { %v1144_v4 = vadd.f32 %v1134_v56, %v1124_v61  ;;  %v1122_v5 = vadd.f32 %v1984_v3, %v1729_v52  ;;  %v1103_v6 = vpop.f32.mrb[7].mxu1  ;;  %v1457_v56 = vld [vmem:[#allocation8 + $0xa0] sm:$0xff]  ;;  %v1443_v3 = vld [vmem:[#allocation8 + $0x30] sm:$0xff] }
 0x3ee   :  { %v1143_v8 = vadd.f32 %v1132_v60, %v1123_v0  ;;  %v1121_v9 = vadd.f32 %v1729_v52, %v1103_v6  ;;  %v2120_v52 = vpack.c.bf16 %v1456_v50, %v1455_v49  ;;  %v2124_v59 = vpack.c.bf16 %v1458_v57, %v1457_v56  ;;  %v1442_v60 = vld [vmem:[#allocation8 + $0x28] sm:$0xff]  ;;  %v1461_v6 = vld [vmem:[#allocation8 + $0xc0] sm:$0xff] }
 0x3ef   :  { %v1152_v14 = vrot.slane %v1144_v4, 4  ;;  %v1126_v15 = vmax.f32 %v1122_v5, 0.0  ;;  %v2126_v61 = vpack.c.bf16 %v1442_v60, %v1441_v58  ;;  %v2128_v0 = vpack.c.bf16 %v1460_v63, %v1459_v62 }
 0x3f0   :  { %v1151_v19 = vrot.slane %v1143_v8, 4  ;;  %v1125_v20 = vmax.f32 %v1121_v9, 0.0  ;;  %1730 = vmatmul.mubr.msk.f32.vlgmr.msra.gmra.mrb[8].mxu0 %vm917_vm8, %v1143_v8  ;;  %2121 = vmatprep.subr.bf16.mxu1 %v2120_v52  ;;  %v1445_v9 = vld [vmem:[#allocation8 + $0x40] sm:$0xff]  ;;  %v1412_v49 = vrot.slane %v1403_v43, %v1411_v44 }
 0x3f1   :  { %v1146_v22 = vadd.f32 %v1138_v18, %v1126_v15  ;;  %2103 = vmatpush1.bf16.msra.mxu0 %v2102_v7  ;;  %1286 = vmatprep.mubr.f32.mxu0 %v2358_v51  ;;  %v1462_v7 = vld [vmem:[#allocation8 + $0xc8] sm:$0xff]  ;;  %v2138_v18 = vpack.c.bf16 %v1448_v17, %v1447_v16  ;;  %v2158_v17 = vpack.c.bf16 %v1570_v13, %v1569_v2 }
 0x3f2   :  { %v1145_v24 = vadd.f32 %v1136_v21, %v1125_v20  ;;  %2105 = vmatprep.subr.bf16.mxu0 %v2104_v10  ;;  %v1158_v28 = vsel %vm1155_vm9, %v1151_v19, %v1152_v14  ;;  %2123 = vmatpush3.bf16.msra.mxu1 %v2122_v55  ;;  %v2132_v8 = vpack.c.bf16 %v1462_v7, %v1461_v6  ;;  %v1446_v10 = vld [vmem:[#allocation8 + $0x48] sm:$0xff] }
 0x3f3   :  { %v1154_v29 = vrot.slane %v1146_v22, 4  ;;  %2125 = vmatprep.subr.bf16.mxu1 %v2124_v59  ;;  %v2134_v11 = vpack.c.bf16 %v1446_v10, %v1445_v9  ;;  %v1466_v20 = vld [vmem:[#allocation8 + $0xe8] sm:$0xff] }
 0x3f4   :  { %v1153_v32 = vrot.slane %v1145_v24, 4  ;;  %1731 = vmatmul.mubr.msk.f32.gmra.mrb[10].mxu0 %vm917_vm8, %v1144_v4  ;;  %v1444_v4 = vld [vmem:[#allocation8 + $0x38] sm:$0xff] }
 0x3f5   :  { %2107 = vmatpush1.bf16.msra.mxu0 %v2106_v23  ;;  %1292 = vmatprep.mubr.f32.mxu0 %v2358_v51  ;;  %v1159_v34 = vsel %vm1155_vm9, %v1154_v29, %v1151_v19  ;;  %v2130_v5 = vpack.c.bf16 %v1444_v4, %v1443_v3  ;;  %v1465_v19 = vld [vmem:[#allocation8 + $0xe0] sm:$0xff]  ;;  %v1450_v23 = vld [vmem:[#allocation8 + $0x68] sm:$0xff] }
 0x3f6   :  { %2109 = vmatprep.subr.bf16.mxu0 %v2108_v25  ;;  %v1157_v38 = vsel %vm1155_vm9, %v1152_v14, %v1153_v32  ;;  %v1156_v39 = vsel %vm1155_vm9, %v1153_v32, %v1154_v29  ;;  %v1168_v41 = vsel %vm1147_vm10, %v1159_v34, 0.0  ;;  %2127 = vmatpush3.bf16.msra.mxu1 %v2126_v61  ;;  %v1464_v14 = vld [vmem:[#allocation8 + $0xd8] sm:$0xff]  ;;  %v2140_v21 = vpack.c.bf16 %v1466_v20, %v1465_v19  ;;  %v1467_v25 = vld [vmem:[#allocation8 + $0xf0] sm:$0xff]  ;;  %v1564_v32 = vld [vmem:[%s2797_s7 + $0x8] sm:$0xff] }
 0x3f7   :  { %v1170_v42 = vsel %vm1149_vm11, %v1157_v38, 0.0  ;;  %2129 = vmatprep.subr.bf16.mxu1 %v2128_v0  ;;  %v2136_v15 = vpack.c.bf16 %v1464_v14, %v1463_v12  ;;  %v2144_v27 = vpack.c.bf16 %v1468_v26, %v1467_v25  ;;  %v1452_v29 = vld [vmem:[#allocation8 + $0x78] sm:$0xff]  ;;  %v2359_v34 = vmov 0.0|0.0   ;;  %v1572_v19 = vld [vmem:[%s2797_s7 + $0x48] sm:$0xff] }
 0x3f8   :  { %1732 = vmatmul.mubr.msk.f32.gmra.mrb[12].mxu0 %vm917_vm8, %v1145_v24  ;;  %v1576_v25 = vld [vmem:[%s2797_s7 + $0x68] sm:$0xff] }
 0x3f9   :  { %2111 = vmatpush1.bf16.msra.mxu0 %v2110_v33  ;;  %1297 = vmatprep.mubr.f32.mxu0 %v2358_v51  ;;  %v1565_v33 = vld [vmem:[%s2797_s7 + $0x10] sm:$0xff] }
 0x3fa   :  { %2113 = vmatprep.subr.bf16.mxu0 %v2112_v35  ;;  %2131 = vmatpush3.bf16.msra.mxu1 %v2130_v5  ;;  %v2149_v35 = vpack.c.bf16 %v1564_v32, %v1563_v31  ;;  %v2152_v37 = vpack.c.bf16 %v1566_v36, %v1565_v33  ;;  %v1738_v33 = vld [vmem:[#allocation10 + $0x6] ss:$0 sm:$0xff] }
 0x3fb   :  { %2133 = vmatprep.subr.bf16.mxu1 %v2132_v8 }
 0x3fc   :  { %1733 = vmatmul.mubr.msk.f32.gmra.mrb[14].mxu0 %vm917_vm8, %v1146_v22  ;;  %v1449_v22 = vld [vmem:[#allocation8 + $0x60] sm:$0xff] }
 0x3fd   :  { %2115 = vmatpush1.bf16.msra.mxu0 %v2114_v40  ;;  %1380 = vmatprep.mubr.f32.mxu0 %v2358_v51  ;;  %v2142_v24 = vpack.c.bf16 %v1450_v23, %v1449_v22  ;;  %v1574_v22 = vld [vmem:[%s2797_s7 + $0x58] sm:$0xff] }
 0x3fe   :  { %2135 = vmatpush3.bf16.msra.mxu1 %v2134_v11  ;;  %2148 = vmatprep.subr.bf16.mxu0 %v2359_v34 }
 0x3ff   :  { %2137 = vmatprep.subr.bf16.mxu1 %v2136_v15  ;;  %v1567_v15 = vld [vmem:[%s2797_s7 + $0x20] sm:$0xff] }
 0x400   :  { %1734 = vmatmul.mubr.msk.f32.vlgmr.msra.gmra.mrb[16].mxu0 %vm917_vm8, %v1168_v41 }
 0x401   :  { %1385 = vmatprep.mubr.f32.mxu0 %v2358_v51  ;;  %2150 = vmatpush3.bf16.msra.mxu0 %v2149_v35 }
 0x402   :  { %2139 = vmatpush3.bf16.msra.mxu1 %v2138_v18  ;;  %2151 = vmatprep.subr.bf16.mxu0 %v2359_v34  ;;  %v1571_v18 = vld [vmem:[%s2797_s7 + $0x40] sm:$0xff] }
 0x403   :  { %2141 = vmatprep.subr.bf16.mxu1 %v2140_v21  ;;  %v2161_v20 = vpack.c.bf16 %v1572_v19, %v1571_v18  ;;  %v1573_v21 = vld [vmem:[%s2797_s7 + $0x50] sm:$0xff] }
 0x404   :  { %1735 = vmatmul.mubr.msk.f32.gmra.mrb[10].mxu0 %vm917_vm8, %v1158_v28  ;;  %v1451_v28 = vld [vmem:[#allocation8 + $0x70] sm:$0xff]  ;;  %v2164_v23 = vpack.c.bf16 %v1574_v22, %v1573_v21 }
 0x405   :  { %1391 = vmatprep.mubr.f32.mxu0 %v2358_v51  ;;  %v2146_v30 = vpack.c.bf16 %v1452_v29, %v1451_v28  ;;  %2153 = vmatpush3.bf16.msra.mxu0 %v2152_v37  ;;  %v1578_v28 = vld [vmem:[%s2797_s7 + $0x78] sm:$0xff] }
 0x406   :  { %2143 = vmatpush3.bf16.msra.mxu1 %v2142_v24  ;;  %2154 = vmatprep.subr.bf16.mxu0 %v2359_v34  ;;  %v1575_v24 = vld [vmem:[%s2797_s7 + $0x60] sm:$0xff] }
 0x407   :  { %2145 = vmatprep.subr.bf16.mxu1 %v2144_v27  ;;  %v2167_v26 = vpack.c.bf16 %v1576_v25, %v1575_v24  ;;  %v1577_v27 = vld [vmem:[%s2797_s7 + $0x70] sm:$0xff] }
 0x408   :  { %1736 = vmatmul.mubr.msk.f32.gmra.mrb[18].mxu0 %vm917_vm8, %v1170_v42  ;;  %v1407_v42 = vsub.s32 0, %v2495_v1  ;;  %v1568_v1 = vld [vmem:[%s2797_s7 + $0x28] sm:$0xff]  ;;  %v2170_v29 = vpack.c.bf16 %v1578_v28, %v1577_v27  ;;  %s2361_s7 = smov [#allocation11]  }
 0x409   :  { %1396 = vmatprep.mubr.f32.mxu0 %v2358_v51  ;;  %v2155_v16 = vpack.c.bf16 %v1568_v1, %v1567_v15  ;;  %s1671_s30 = sshll.u32 %s2361_s7, 4  ;;  %s1672_s30 = int_to_ptr.vmem [resolvable:$true] %s1671_s30 }
 0x40a   :  { %2147 = vmatpush3.bf16.msra.mxu1 %v2146_v30  ;;  %v1408_v45 = vrot.slane %v1403_v43, %v1407_v42  ;;  %s2317_s11 = scalar_lea.vmem %s1672_s30, 32  ;;  %p2322_p13 = scmp.lt.s32.totalorder %s1672_s30, %s1672_s30 }
 0x40b   :  { %2156 = vmatpush3.bf16.msra.mxu0 %v2155_v16  ;;  %p2318_p12 = scmp.ne.s32.totalorder %s1672_s30, %s2317_s11  ;;  %p2323_p0 = scmp.lt.s32.totalorder %s2317_s11, %s2317_s11 }
 0x40c   :  { %1737 = vmatmul.mubr.msk.f32.gmra.mrb[14].mxu0 %vm917_vm8, %v1156_v39  ;;  %2157 = vmatprep.subr.bf16.mxu0 %v2359_v34 }
 0x40d   :  { %2017 = vmatprep.mubr.msk.f32.mxu0 %vm2360_vm12, %v2358_v51  ;;  %p2324_p1 = por %p2323_p0, %p2322_p13 }
 0x40f   :  { %2159 = vmatpush3.bf16.msra.mxu0 %v2158_v17  ;;  %p2325_p2 = pnand %p2324_p1, %p2318_p12 }
 0x410   :  { %2160 = vmatprep.subr.bf16.mxu0 %v2359_v34 }
 0x413   :  { %2162 = vmatpush3.bf16.msra.mxu0 %v2161_v20 }
 0x414   :  { %2163 = vmatprep.subr.bf16.mxu0 %v2359_v34 }
 0x417   :  { %2165 = vmatpush3.bf16.msra.mxu0 %v2164_v23 }
 0x418   :  { %2166 = vmatprep.subr.bf16.mxu0 %v2359_v34 }
 0x41b   :  { %2168 = vmatpush3.bf16.msra.mxu0 %v2167_v26 }
 0x41c   :  { %2169 = vmatprep.subr.bf16.mxu0 %v2359_v34 }
 0x41f   :  { %2171 = vmatpush3.bf16.msra.mxu0 %v2170_v29 }
 0x4c3   :  { %v1283_v38 = vpop.f32.mrb[8].mxu0 }
 0x4c4   :  { %v1285_v39 = vpop.f32.mrb[9].mxu0 }
 0x4cb   :  { %v1294_v40 = vpop.f32.mrb[12].mxu0 }
 0x4cc   :  { %v1296_v41 = vpop.f32.mrb[13].mxu0 }
 0x4d3   :  { %v1382_v46 = vpop.f32.mrb[16].mxu0 }
 0x4d4   :  { %v1383_v47 = vadd.f32 %v1382_v46, %v1283_v38  ;;  %v1384_v48 = vpop.f32.mrb[17].mxu0 }
 0x4d6   :  { %v1415_v50 = vadd.f32 %v1408_v45, %v1383_v47 }
 0x4d7   :  { %v1387_v52 = vpop.f32.mrb[10].mxu0 }
 0x4d8   :  { %v1421_v53 = vmax.f32 %v1415_v50, 0.0  ;;  %v1416_v54 = vadd.f32 %v1408_v45, %v1387_v52  ;;  %v1389_v55 = vpop.f32.mrb[11].mxu0 }
 0x4d9   :  { %v2721_v56 = vadd.f32 %v1412_v49, %v1389_v55 }
 0x4da   :  { %v1422_v57 = vmax.f32 %v1416_v54, 0.0  ;;  %1540 = vmatprep.mubr.f32.mxu1 %v1421_v53  ;;  %v1425_v59 = vrot.slane %v1421_v53, 4 }
 0x4db   :  { %v1393_v58 = vpop.f32.mrb[18].mxu0 }
 0x4dc   :  { %v1426_v60 = vrot.slane %v1422_v57, 4  ;;  %v1394_v61 = vadd.f32 %v1393_v58, %v1294_v40  ;;  %v1395_v62 = vpop.f32.mrb[19].mxu0 }
 0x4de   :  { %v1418_v63 = vadd.f32 %v1408_v45, %v1394_v61  ;;  %v1431_v0 = vsel %vm1155_vm9, %v1425_v59, %v1426_v60 }
 0x4df   :  { %v1398_v3 = vpop.f32.mrb[14].mxu0 }
 0x4e0   :  { %v1423_v4 = vmax.f32 %v1418_v63, 0.0  ;;  %v1419_v5 = vadd.f32 %v1408_v45, %v1398_v3  ;;  %v1400_v6 = vpop.f32.mrb[15].mxu0 }
 0x4e1   :  { %v1420_v7 = vadd.f32 %v1412_v49, %v1400_v6  ;;  %v1741_v49 = vld [vmem:[#allocation10 + $0x7] ss:$0 sm:$0xff] }
 0x4e2   :  { %v1427_v8 = vrot.slane %v1423_v4, 4  ;;  %v1424_v9 = vmax.f32 %v1419_v5, 0.0 }
 0x4e4   :  { %v1428_v10 = vrot.slane %v1424_v9, 4  ;;  %v1430_v11 = vsel %vm1155_vm9, %v1426_v60, %v1427_v8 }
 0x4e6   :  { %v1432_v12 = vsel %vm1155_vm9, %v1428_v10, %v1425_v59  ;;  %v1429_v14 = vsel %vm1155_vm9, %v1427_v8, %v1428_v10 }
 0x4e7   :  { %1739 = vmatmul.mubr.msk.f32.vlgmr.msra.gmra.mrb[8].mxu1 %vm1147_vm10, %v1432_v12 }
 0x4e8   :  { %1544 = vmatprep.mubr.f32.mxu1 %v1422_v57 }
 0x4eb   :  { %1545 = vmatmul.mubr.f32.gmra.mrb[10].mxu1 %v1431_v0 }
 0x4ec   :  { %1549 = vmatprep.mubr.f32.mxu1 %v1423_v4 }
 0x4ef   :  { %1740 = vmatmul.mubr.msk.f32.gmra.mrb[12].mxu1 %vm1149_vm11, %v1430_v11 }
 0x4f0   :  { %1553 = vmatprep.mubr.f32.mxu1 %v1424_v9 }
 0x4f3   :  { %1554 = vmatmul.mubr.f32.gmra.mrb[14].mxu1 %v1429_v14 }
 0x5ba   :  { %v1840_v30 = vpop.f32.mrb[8].mxu1 }
 0x5bb   :  { %v1841_v31 = vpop.f32.mrb[9].mxu1 }
 0x5be   :  { %v1843_v32 = vpop.f32.mrb[10].mxu1 }
 0x5bf   :  { %v1844_v35 = vpop.f32.mrb[11].mxu1 }
 0x5c0   :  { %v1845_v36 = vadd.f32 %v1844_v35, %v1843_v32 }
 0x5c2   :  { %v1547_v34 = vadd.f32 %v1845_v36, %v1738_v33  ;;  %v1846_v37 = vpop.f32.mrb[12].mxu1 }
 0x5c3   :  { %v1847_v38 = vpop.f32.mrb[13].mxu1 }
 0x5c4   :  { %v1559_v39 = vmax.f32 %v1547_v34, 0.0 }
 0x5c6   :  { %v1561_v40 = vadd.f32 %v1559_v39, %v2721_v56  ;;  %v1849_v41 = vpop.f32.mrb[14].mxu1 }
 0x5c7   :  { %v1850_v42 = vpop.f32.mrb[15].mxu1 }
 0x5c8   :  { %v1851_v43 = vadd.f32 %v1850_v42, %v1849_v41  ;;  %v1588_v51 = vrot.slane %v1561_v40, 7 }
 0x5ca   :  { %v1556_v44 = vadd.f32 %v1851_v43, %v1738_v33 }
 0x5cc   :  { %v1560_v45 = vmax.f32 %v1556_v44, 0.0 }
 0x5ce   :  { %v1562_v46 = vadd.f32 %v1560_v45, %v1420_v7 }
 0x5d0   :  { %v1589_v47 = vrot.slane %v1562_v46, 6 }
 0x5d2   :  { %v1591_v48 = vsel %vm1590_vm13, %v1589_v47, %v1588_v51 }
 0x5d3   :  { %2018 = vmatmul.mubr.f32.vlgmr.msra.gmra.mrb[20].mxu0 %v1591_v48 }
 0x6a6   :  { %v1659_v50 = vpop.f32.mrb[20].mxu0 }
 0x6a7   :  { %v1660_v52 = vadd.f32 %v1741_v49, %v1659_v50  ;;  %v2019_v53 = vpop.f32.mrb[21].mxu0 }
 0x6a9   :  { %1664 = vst.msk [vmem:[#allocation11] sm:$0x3] %vm1663_vm14, %v1660_v52 }
 0x6aa   :  { %2328 = shalt.err (!%p2325_p2)
}
 0x6ab   :  { %s2329_s10 = scalar_lea.hbm %s2799_s9, 32 }
 0x6ac   :  { %p2330_p3 = scmp.ne.s32.totalorder %s2799_s9, %s2329_s10  ;;  %p2333_p4 = scmp.lt.u32.totalorder %s2329_s10, %s2799_s9 }
 0x6ae   :  { %p2335_p5 = pnand %p2333_p4, %p2330_p3 }
 0x6b0   :  { %2338 = shalt.err (!%p2335_p5)
}
 0x6b1   :  { %1674 = dma.vmem_to_hbm [thread:$0]  %s1672_s30, 32, %s2799_s9, [#allocation4]  }
 0x6b2   :  { %2345 = dma.done.wait [#allocation4], 32  }
 0x6b3   :  { %2346 = vsyncadd [#allocation4], 4294967264 }
 0x6b4   :  { %1678 = vsyncpa [#allocation3], 1 }
 0x6b5   :  { %1679 = vsyncpa [#allocation6], 1 }
 0x6b6   :  { %1680 = vsyncpa [#allocation9], 1 }
 0x6b7   :  { %1681 = vsyncpa [#allocation4], 1 }

</bundles_post_ra>
